<compile_context>
chip_gen: v5e
topology: v5e:2x2
jax: 0.10.0
libtpu: 0.0.40
codegen_flags: <defaults>
</compile_context>

<pallas_src>
import math
import functools

import numpy as np
import jax
import jax.numpy as jnp
from jax import lax
from jax.experimental import pallas as pl
from jax.experimental.pallas import tpu as pltpu

_EPS = 1e-5
_MXU_DTYPE = jnp.bfloat16     # matmul operand dtype (accumulation is f32)
_LANE = 128                   # vreg lane width
_SUBLANE = 8                  # f32 sublane tile


def _round_up(x, m):
    return ((x + m - 1) // m) * m


# -----------------------------------------------------------------------------
# In-kernel helpers (trace-time; everything lives in VMEM / vregs)
# -----------------------------------------------------------------------------
def _gcbn(pieces, a, ptab_ref, meta):
    """GraphConv(aggr='add') -> NodeLevelBatchNorm (batch stats) -> ReLU.

    `pieces` is the layer input split along channels.  The DenseNet-style
    channel concat is never materialised: GraphConv weights are row-split on
    the host, so  concat(pieces) @ W == sum_i pieces[i] @ W[rows_i].  This
    removes every in-kernel lane concat / masked store.

    GraphConv bias is omitted: it is constant over nodes and exactly cancelled
    by the training-mode BatchNorm mean subtraction.
    """
    cout = meta["cout"]
    cin = sum(int(p.shape[1]) for p in pieces)
    ws_off, wn_off, gb_row = meta["ws_off"], meta["wn_off"], meta["gb_row"]

    def row_split_matmul(base_off):
        acc, r = None, 0
        for p in pieces:
            c = int(p.shape[1])
            w = ptab_ref[base_off + r: base_off + r + c, 0:cout].astype(_MXU_DTYPE)
            t = jnp.dot(p, w, preferred_element_type=jnp.float32)
            acc = t if acc is None else acc + t
            r += c
        return acc

    h = row_split_matmul(ws_off)                           # x @ W_self  [N,cout] f32
    if cout < cin:
        # Reassociate so the dominant N x N aggregation runs at width cout.
        xn = row_split_matmul(wn_off).astype(_MXU_DTYPE)   # x @ W_nbr
        h = h + jnp.dot(a, xn, preferred_element_type=jnp.float32)
    else:
        # Aggregate first (width cin <= cout), then project.
        r = 0
        for p in pieces:
            c = int(p.shape[1])
            agg = jnp.dot(a, p, preferred_element_type=jnp.float32).astype(_MXU_DTYPE)
            w = ptab_ref[wn_off + r: wn_off + r + c, 0:cout].astype(_MXU_DTYPE)
            h = h + jnp.dot(agg, w, preferred_element_type=jnp.float32)
            r += c

    # NodeLevelBatchNorm (training-mode batch statistics, biased variance) +
    # ReLU.  Single sweep: var = E[h^2] - mean^2, gamma folded into the scale.
    gamma = ptab_ref[gb_row: gb_row + 1, 0:cout]
    beta = ptab_ref[gb_row + 1: gb_row + 2, 0:cout]
    mean = jnp.mean(h, axis=0, keepdims=True)
    msq = jnp.mean(h * h, axis=0, keepdims=True)
    var = jnp.maximum(msq - mean * mean, 0.0)
    scale = lax.rsqrt(var + _EPS) * gamma
    shift = beta - mean * scale
    return jnp.maximum(h * scale + shift, 0.0).astype(_MXU_DTYPE)


def _fused_forward_kernel(spec, x_ref, a_ref, p_ref, invc_ref, ptab_ref, o_ref):
    """Entire GraphMSNet forward in one kernel body (unrolled at trace time)."""
    a = a_ref[...]                                         # [N, N] bf16, loaded once

    # features.conv0
    x = _gcbn([x_ref[...]], a, ptab_ref, spec["conv0"])

    # features.blockN / transitionN
    for layers, trans in zip(spec["blocks"], spec["transitions"]):
        feats = [x]                                        # MultiScaleBlock outputs
        h = x
        for layer in layers:
            h = _gcbn([h], a, ptab_ref, layer["conv1"])    # ConvLayer.conv1
            h = _gcbn([h], a, ptab_ref, layer["conv2"])    # ConvLayer.conv2
            feats.append(h)
        # transition over the (virtual) dense concat -- no concat materialised.
        x = _gcbn(feats, a, ptab_ref, trans)

    # global_mean_pool + Linear classifier (fused tail)
    cls = spec["classifier"]
    wc = ptab_ref[cls["w_off"]: cls["w_off"] + cls["cin"],
                  0:cls["cout"]].astype(_MXU_DTYPE)
    bc = ptab_ref[cls["b_row"]: cls["b_row"] + 1, 0:cls["cout"]]
    pooled = (jnp.dot(p_ref[...], x, preferred_element_type=jnp.float32)
              * invc_ref[...]).astype(_MXU_DTYPE)          # [G, C]
    o_ref[...] = jnp.dot(pooled, wc, preferred_element_type=jnp.float32) + bc


# -----------------------------------------------------------------------------
# Host-side helpers
# -----------------------------------------------------------------------------
def _vmem_limit_bytes(working_set_bytes):
    """Per-generation scoped-VMEM budget (v5e/v6e: 128 MiB, v7x: 64 MiB phys)."""
    cap = 0
    try:
        get_info = getattr(pltpu, "get_tpu_info", None)
        if get_info is not None:
            cap = int(getattr(get_info(), "vmem_capacity_bytes", 0) or 0)
    except Exception:
        cap = 0
    if cap <= 0:
        cap = 64 << 20                       # conservative default (v7x physical)
    hi = max(min((cap * 3) // 4, 100 << 20), 16 << 20)
    return int(min(max(2 * working_set_bytes + (8 << 20), 16 << 20), hi))


def _estimate_cost(spec, N, G, in_bytes, out_bytes):
    flops, trans = 0, 0

    def visit(m):
        nonlocal flops, trans
        cin, cout = m["cin"], m["cout"]
        flops += 4 * N * cin * cout + 2 * N * N * min(cin, cout)
        trans += cout                        # one rsqrt per output channel

    visit(spec["conv0"])
    for layers, tr in zip(spec["blocks"], spec["transitions"]):
        for l in layers:
            visit(l["conv1"])
            visit(l["conv2"])
        visit(tr)
    cls = spec["classifier"]
    flops += 2 * G * N * cls["cin"] + 2 * G * cls["cin"] * cls["cout"]
    return pl.CostEstimate(flops=int(flops), transcendentals=int(trans),
                           bytes_accessed=int(in_bytes + out_bytes))


def graph_msnet_forward(x, A, P, inv_counts, model):
    spec, ptab = model["spec"], model["param_table"]
    N = x.shape[0]
    G = P.shape[0]
    out_dim = spec["classifier"]["cout"]

    vmem = pl.BlockSpec(memory_space=pltpu.MemorySpace.VMEM)
    inputs = (x.astype(_MXU_DTYPE), A.astype(_MXU_DTYPE), P.astype(_MXU_DTYPE),
              inv_counts.astype(jnp.float32), ptab)

    in_bytes = sum(int(np.prod(t.shape)) * t.dtype.itemsize for t in inputs)
    out_bytes = G * out_dim * 4
    act_bytes = 32 * N * spec["max_width"]          # rough live-activation estimate

    kernel = functools.partial(_fused_forward_kernel, spec)
    return pl.pallas_call(
        kernel,
        out_shape=jax.ShapeDtypeStruct((G, out_dim), jnp.float32),
        in_specs=[vmem] * len(inputs),
        out_specs=vmem,
        compiler_params=pltpu.CompilerParams(
            vmem_limit_bytes=_vmem_limit_bytes(in_bytes + act_bytes)),
        cost_estimate=_estimate_cost(spec, N, G, in_bytes, out_bytes),
    )(*inputs)


# -----------------------------------------------------------------------------
# Parameter construction + packing (deterministic)
# -----------------------------------------------------------------------------
def init_model(key, num_input_features, out_dim, growth_rate=32,
               block_config=(3, 3, 3, 3), bn_sizes=(2, 3, 4, 4)):
    """Initialise all weights (PyTorch-style uniform) and pack them into ONE
    128-lane-padded f32 table so the kernel receives 5 inputs total instead of
    ~40 tiny per-parameter DMAs.  Returns {"spec": static-offsets, "param_table"}."""
    # ---- static channel plan ------------------------------------------------
    plan = {"conv0": (num_input_features, 32), "blocks": [], "transitions": []}
    nf = 32
    for i, num_layers in enumerate(block_config):
        mid = int(growth_rate * bn_sizes[i])
        layers = []
        for l in range(num_layers):
            cin = nf if l == 0 else growth_rate
            layers.append(((cin, mid), (mid, growth_rate)))
        plan["blocks"].append(layers)
        nf += int(num_layers * growth_rate)
        plan["transitions"].append((nf, nf // 2))
        nf //= 2
    plan["classifier"] = (nf, out_dim)

    all_couts = [plan["conv0"][1], out_dim] + [t[1] for t in plan["transitions"]]
    for layers in plan["blocks"]:
        for (c1, c2) in layers:
            all_couts += [c1[1], c2[1]]
    CW = _round_up(max(all_couts), _LANE)              # lane-padded table width

    chunks = []
    state = {"rows": 0}

    def add_weight(w):                                 # [cin, cout], 8-row aligned start
        cin, cout = w.shape
        pad = (-state["rows"]) % _SUBLANE
        if pad:
            chunks.append(jnp.zeros((pad, CW), jnp.float32))
            state["rows"] += pad
        off = state["rows"]
        chunks.append(jnp.zeros((cin, CW), jnp.float32).at[:, :cout].set(w))
        state["rows"] += cin
        return off

    def add_rows(vs):                                  # consecutive 1-D rows
        row0 = state["rows"]
        for v in vs:
            chunks.append(jnp.zeros((1, CW), jnp.float32).at[0, :v.shape[0]].set(v))
            state["rows"] += 1
        return row0

    keys = iter(jax.random.split(key, 64))

    def make_gcbn(cin, cout):
        k1, k2 = jax.random.split(next(keys))
        s = 1.0 / math.sqrt(cin)
        w_self = jax.random.uniform(k1, (cin, cout), jnp.float32, -s, s)
        w_nbr = jax.random.uniform(k2, (cin, cout), jnp.float32, -s, s)
        # GraphConv bias omitted (cancelled by training-mode BN mean).
        return {"cin": cin, "cout": cout,
                "ws_off": add_weight(w_self),
                "wn_off": add_weight(w_nbr),
                "gb_row": add_rows([jnp.ones((cout,), jnp.float32),
                                    jnp.zeros((cout,), jnp.float32)])}

    spec = {"conv0": make_gcbn(*plan["conv0"]), "blocks": [], "transitions": []}
    for layers, tr in zip(plan["blocks"], plan["transitions"]):
        lmetas = [{"conv1": make_gcbn(*c1), "conv2": make_gcbn(*c2)}
                  for (c1, c2) in layers]
        spec["blocks"].append(lmetas)
        spec["transitions"].append(make_gcbn(*tr))

    cin, cout = plan["classifier"]
    k1, k2 = jax.random.split(next(keys))
    s = 1.0 / math.sqrt(cin)
    wc = jax.random.uniform(k1, (cin, cout), jnp.float32, -s, s)
    bc = jax.random.uniform(k2, (cout,), jnp.float32, -s, s)
    spec["classifier"] = {"cin": cin, "cout": cout,
                          "w_off": add_weight(wc), "b_row": add_rows([bc])}

    pad = (-state["rows"]) % _SUBLANE
    if pad:
        chunks.append(jnp.zeros((pad, CW), jnp.float32))
    param_table = jnp.concatenate(chunks, axis=0)      # single f32 [R, CW] table

    widths = [spec["conv0"]["cin"], spec["conv0"]["cout"]]
    for layers, tr in zip(spec["blocks"], spec["transitions"]):
        for l in layers:
            for k in ("conv1", "conv2"):
                widths += [l[k]["cin"], l[k]["cout"]]
        widths += [tr["cin"], tr["cout"]]
    spec["max_width"] = max(widths)

    return {"spec": spec, "param_table": param_table}


# -----------------------------------------------------------------------------
if __name__ == "__main__":
    key = jax.random.PRNGKey(0)
    kx, kp = jax.random.split(key)

    # Small synthetic problem: 2 graphs, 8 nodes each (ring graphs).
    N_per_graph, G = 8, 2
    N = N_per_graph * G
    num_input_features = 12
    out_dim = 4
    growth_rate = 8
    block_config = (2, 2)
    bn_sizes = (2, 2)

    x = jax.random.normal(kx, (N, num_input_features), dtype=jnp.float32)

    # Dense adjacency: undirected ring inside each graph.
    A_np = np.zeros((N, N), dtype=np.float32)
    for g in range(G):
        base = g * N_per_graph
        for i in range(N_per_graph):
            u = base + i
            v = base + (i + 1) % N_per_graph
            A_np[u, v] = 1.0
            A_np[v, u] = 1.0
    A = jnp.asarray(A_np)

    # batch vector -> one-hot pooling matrix P [G, N] and per-graph 1/count.
    batch = jnp.repeat(jnp.arange(G), N_per_graph)
    P = (batch[None, :] == jnp.arange(G)[:, None]).astype(jnp.float32)
    inv_counts = 1.0 / jnp.sum(P, axis=1, keepdims=True)

    model = init_model(kp, num_input_features, out_dim, growth_rate,
                       block_config, bn_sizes)

    out = graph_msnet_forward(x, A, P, inv_counts, model)
    out = jax.block_until_ready(out)
    assert out.shape == (G, out_dim) and out.dtype == jnp.float32
    assert bool(jnp.all(jnp.isfinite(out)))
    print("KERNEL_OK")
</pallas_src>

<mosaic_0001>
module attributes {stable_mosaic.version = 11 : i64} {
  func.func @_fused_forward_kernel(%arg0: memref<16x12xbf16, #tpu.memory_space<vmem>>, %arg1: memref<16x16xbf16, #tpu.memory_space<vmem>>, %arg2: memref<2x16xbf16, #tpu.memory_space<vmem>>, %arg3: memref<2x1xf32, #tpu.memory_space<vmem>>, %arg4: memref<584x128xf32, #tpu.memory_space<vmem>>, %arg5: memref<2x4xf32, #tpu.memory_space<vmem>>) attributes {dimension_semantics = [], scalar_prefetch = 0 : i64, scratch_operands = 0 : i64, tpu.core_type = #tpu.core_type<tc>} {
    %c0 = arith.constant 0 : index
    %c0_0 = arith.constant 0 : index
    %0 = vector.load %arg1[%c0, %c0_0] : memref<16x16xbf16, #tpu.memory_space<vmem>>, vector<16x16xbf16>
    %c0_1 = arith.constant 0 : index
    %c0_2 = arith.constant 0 : index
    %1 = vector.load %arg0[%c0_1, %c0_2] : memref<16x12xbf16, #tpu.memory_space<vmem>>, vector<16x12xbf16>
    %c0_3 = arith.constant 0 : index
    %c0_4 = arith.constant 0 : index
    %2 = vector.load %arg4[%c0_3, %c0_4] : memref<584x128xf32, #tpu.memory_space<vmem>>, vector<12x32xf32>
    %3 = arith.truncf %2 : vector<12x32xf32> to vector<12x32xbf16>
    %cst = arith.constant dense<0.000000e+00> : vector<16x32xf32>
    %4 = tpu.matmul %1, %3, %cst {dimension_numbers = #tpu.dot_dimension_numbers<[1], [0], [0], [1], [0, 0, 1, 1], [], []>} : vector<16x12xbf16>, vector<12x32xbf16>, vector<16x32xf32> -> vector<16x32xf32>
    %cst_5 = arith.constant dense<0.000000e+00> : vector<16x12xf32>
    %5 = tpu.matmul %0, %1, %cst_5 {dimension_numbers = #tpu.dot_dimension_numbers<[1], [0], [0], [1], [0, 0, 1, 1], [], []>} : vector<16x16xbf16>, vector<16x12xbf16>, vector<16x12xf32> -> vector<16x12xf32>
    %6 = arith.truncf %5 : vector<16x12xf32> to vector<16x12xbf16>
    %c16 = arith.constant 16 : index
    %c0_6 = arith.constant 0 : index
    %7 = vector.load %arg4[%c16, %c0_6] : memref<584x128xf32, #tpu.memory_space<vmem>>, vector<12x32xf32>
    %8 = arith.truncf %7 : vector<12x32xf32> to vector<12x32xbf16>
    %cst_7 = arith.constant dense<0.000000e+00> : vector<16x32xf32>
    %9 = tpu.matmul %6, %8, %cst_7 {dimension_numbers = #tpu.dot_dimension_numbers<[1], [0], [0], [1], [0, 0, 1, 1], [], []>} : vector<16x12xbf16>, vector<12x32xbf16>, vector<16x32xf32> -> vector<16x32xf32>
    %10 = arith.addf %4, %9 : vector<16x32xf32>
    %c28 = arith.constant 28 : index
    %c0_8 = arith.constant 0 : index
    %11 = vector.load %arg4[%c28, %c0_8] : memref<584x128xf32, #tpu.memory_space<vmem>>, vector<1x32xf32>
    %c29 = arith.constant 29 : index
    %c0_9 = arith.constant 0 : index
    %12 = vector.load %arg4[%c29, %c0_9] : memref<584x128xf32, #tpu.memory_space<vmem>>, vector<1x32xf32>
    %cst_10 = arith.constant dense<0.000000e+00> : vector<32xf32>
    %13 = vector.multi_reduction <add>, %10, %cst_10 [0] : vector<16x32xf32> to vector<32xf32>
    %14 = vector.shape_cast %13 : vector<32xf32> to vector<1x32xf32>
    %cst_11 = arith.constant 1.600000e+01 : f32
    %15 = vector.broadcast %cst_11 : f32 to vector<1x32xf32>
    %16 = arith.divf %14, %15 : vector<1x32xf32>
    %17 = arith.mulf %10, %10 : vector<16x32xf32>
    %cst_12 = arith.constant dense<0.000000e+00> : vector<32xf32>
    %18 = vector.multi_reduction <add>, %17, %cst_12 [0] : vector<16x32xf32> to vector<32xf32>
    %19 = vector.shape_cast %18 : vector<32xf32> to vector<1x32xf32>
    %cst_13 = arith.constant 1.600000e+01 : f32
    %20 = vector.broadcast %cst_13 : f32 to vector<1x32xf32>
    %21 = arith.divf %19, %20 : vector<1x32xf32>
    %22 = arith.mulf %16, %16 : vector<1x32xf32>
    %23 = arith.subf %21, %22 : vector<1x32xf32>
    %cst_14 = arith.constant 0.000000e+00 : f32
    %24 = vector.broadcast %cst_14 : f32 to vector<1x32xf32>
    %25 = arith.maximumf %23, %24 : vector<1x32xf32>
    %cst_15 = arith.constant 9.99999974E-6 : f32
    %26 = vector.broadcast %cst_15 : f32 to vector<1x32xf32>
    %27 = arith.addf %25, %26 : vector<1x32xf32>
    %28 = math.rsqrt %27 : vector<1x32xf32>
    %29 = arith.mulf %28, %11 : vector<1x32xf32>
    %30 = arith.mulf %16, %29 : vector<1x32xf32>
    %31 = arith.subf %12, %30 : vector<1x32xf32>
    %32 = vector.broadcast %29 : vector<1x32xf32> to vector<16x32xf32>
    %33 = arith.mulf %10, %32 : vector<16x32xf32>
    %34 = vector.broadcast %31 : vector<1x32xf32> to vector<16x32xf32>
    %35 = arith.addf %33, %34 : vector<16x32xf32>
    %cst_16 = arith.constant 0.000000e+00 : f32
    %36 = vector.broadcast %cst_16 : f32 to vector<16x32xf32>
    %37 = arith.maximumf %35, %36 : vector<16x32xf32>
    %38 = arith.truncf %37 : vector<16x32xf32> to vector<16x32xbf16>
    %c32 = arith.constant 32 : index
    %c0_17 = arith.constant 0 : index
    %39 = vector.load %arg4[%c32, %c0_17] : memref<584x128xf32, #tpu.memory_space<vmem>>, vector<32x16xf32>
    %40 = arith.truncf %39 : vector<32x16xf32> to vector<32x16xbf16>
    %cst_18 = arith.constant dense<0.000000e+00> : vector<16x16xf32>
    %41 = tpu.matmul %38, %40, %cst_18 {dimension_numbers = #tpu.dot_dimension_numbers<[1], [0], [0], [1], [0, 0, 1, 1], [], []>} : vector<16x32xbf16>, vector<32x16xbf16>, vector<16x16xf32> -> vector<16x16xf32>
    %c64 = arith.constant 64 : index
    %c0_19 = arith.constant 0 : index
    %42 = vector.load %arg4[%c64, %c0_19] : memref<584x128xf32, #tpu.memory_space<vmem>>, vector<32x16xf32>
    %43 = arith.truncf %42 : vector<32x16xf32> to vector<32x16xbf16>
    %cst_20 = arith.constant dense<0.000000e+00> : vector<16x16xf32>
    %44 = tpu.matmul %38, %43, %cst_20 {dimension_numbers = #tpu.dot_dimension_numbers<[1], [0], [0], [1], [0, 0, 1, 1], [], []>} : vector<16x32xbf16>, vector<32x16xbf16>, vector<16x16xf32> -> vector<16x16xf32>
    %45 = arith.truncf %44 : vector<16x16xf32> to vector<16x16xbf16>
    %cst_21 = arith.constant dense<0.000000e+00> : vector<16x16xf32>
    %46 = tpu.matmul %0, %45, %cst_21 {dimension_numbers = #tpu.dot_dimension_numbers<[1], [0], [0], [1], [0, 0, 1, 1], [], []>} : vector<16x16xbf16>, vector<16x16xbf16>, vector<16x16xf32> -> vector<16x16xf32>
    %47 = arith.addf %41, %46 : vector<16x16xf32>
    %c96 = arith.constant 96 : index
    %c0_22 = arith.constant 0 : index
    %48 = vector.load %arg4[%c96, %c0_22] : memref<584x128xf32, #tpu.memory_space<vmem>>, vector<1x16xf32>
    %c97 = arith.constant 97 : index
    %c0_23 = arith.constant 0 : index
    %49 = vector.load %arg4[%c97, %c0_23] : memref<584x128xf32, #tpu.memory_space<vmem>>, vector<1x16xf32>
    %cst_24 = arith.constant dense<0.000000e+00> : vector<16xf32>
    %50 = vector.multi_reduction <add>, %47, %cst_24 [0] : vector<16x16xf32> to vector<16xf32>
    %51 = vector.shape_cast %50 : vector<16xf32> to vector<1x16xf32>
    %cst_25 = arith.constant 1.600000e+01 : f32
    %52 = vector.broadcast %cst_25 : f32 to vector<1x16xf32>
    %53 = arith.divf %51, %52 : vector<1x16xf32>
    %54 = arith.mulf %47, %47 : vector<16x16xf32>
    %cst_26 = arith.constant dense<0.000000e+00> : vector<16xf32>
    %55 = vector.multi_reduction <add>, %54, %cst_26 [0] : vector<16x16xf32> to vector<16xf32>
    %56 = vector.shape_cast %55 : vector<16xf32> to vector<1x16xf32>
    %cst_27 = arith.constant 1.600000e+01 : f32
    %57 = vector.broadcast %cst_27 : f32 to vector<1x16xf32>
    %58 = arith.divf %56, %57 : vector<1x16xf32>
    %59 = arith.mulf %53, %53 : vector<1x16xf32>
    %60 = arith.subf %58, %59 : vector<1x16xf32>
    %cst_28 = arith.constant 0.000000e+00 : f32
    %61 = vector.broadcast %cst_28 : f32 to vector<1x16xf32>
    %62 = arith.maximumf %60, %61 : vector<1x16xf32>
    %cst_29 = arith.constant 9.99999974E-6 : f32
    %63 = vector.broadcast %cst_29 : f32 to vector<1x16xf32>
    %64 = arith.addf %62, %63 : vector<1x16xf32>
    %65 = math.rsqrt %64 : vector<1x16xf32>
    %66 = arith.mulf %65, %48 : vector<1x16xf32>
    %67 = arith.mulf %53, %66 : vector<1x16xf32>
    %68 = arith.subf %49, %67 : vector<1x16xf32>
    %69 = vector.broadcast %66 : vector<1x16xf32> to vector<16x16xf32>
    %70 = arith.mulf %47, %69 : vector<16x16xf32>
    %71 = vector.broadcast %68 : vector<1x16xf32> to vector<16x16xf32>
    %72 = arith.addf %70, %71 : vector<16x16xf32>
    %cst_30 = arith.constant 0.000000e+00 : f32
    %73 = vector.broadcast %cst_30 : f32 to vector<16x16xf32>
    %74 = arith.maximumf %72, %73 : vector<16x16xf32>
    %75 = arith.truncf %74 : vector<16x16xf32> to vector<16x16xbf16>
    %c104 = arith.constant 104 : index
    %c0_31 = arith.constant 0 : index
    %76 = vector.load %arg4[%c104, %c0_31] : memref<584x128xf32, #tpu.memory_space<vmem>>, vector<16x8xf32>
    %77 = arith.truncf %76 : vector<16x8xf32> to vector<16x8xbf16>
    %cst_32 = arith.constant dense<0.000000e+00> : vector<16x8xf32>
    %78 = tpu.matmul %75, %77, %cst_32 {dimension_numbers = #tpu.dot_dimension_numbers<[1], [0], [0], [1], [0, 0, 1, 1], [], []>} : vector<16x16xbf16>, vector<16x8xbf16>, vector<16x8xf32> -> vector<16x8xf32>
    %c120 = arith.constant 120 : index
    %c0_33 = arith.constant 0 : index
    %79 = vector.load %arg4[%c120, %c0_33] : memref<584x128xf32, #tpu.memory_space<vmem>>, vector<16x8xf32>
    %80 = arith.truncf %79 : vector<16x8xf32> to vector<16x8xbf16>
    %cst_34 = arith.constant dense<0.000000e+00> : vector<16x8xf32>
    %81 = tpu.matmul %75, %80, %cst_34 {dimension_numbers = #tpu.dot_dimension_numbers<[1], [0], [0], [1], [0, 0, 1, 1], [], []>} : vector<16x16xbf16>, vector<16x8xbf16>, vector<16x8xf32> -> vector<16x8xf32>
    %82 = arith.truncf %81 : vector<16x8xf32> to vector<16x8xbf16>
    %cst_35 = arith.constant dense<0.000000e+00> : vector<16x8xf32>
    %83 = tpu.matmul %0, %82, %cst_35 {dimension_numbers = #tpu.dot_dimension_numbers<[1], [0], [0], [1], [0, 0, 1, 1], [], []>} : vector<16x16xbf16>, vector<16x8xbf16>, vector<16x8xf32> -> vector<16x8xf32>
    %84 = arith.addf %78, %83 : vector<16x8xf32>
    %c136 = arith.constant 136 : index
    %c0_36 = arith.constant 0 : index
    %85 = vector.load %arg4[%c136, %c0_36] : memref<584x128xf32, #tpu.memory_space<vmem>>, vector<1x8xf32>
    %c137 = arith.constant 137 : index
    %c0_37 = arith.constant 0 : index
    %86 = vector.load %arg4[%c137, %c0_37] : memref<584x128xf32, #tpu.memory_space<vmem>>, vector<1x8xf32>
    %cst_38 = arith.constant dense<0.000000e+00> : vector<8xf32>
    %87 = vector.multi_reduction <add>, %84, %cst_38 [0] : vector<16x8xf32> to vector<8xf32>
    %88 = vector.shape_cast %87 : vector<8xf32> to vector<1x8xf32>
    %cst_39 = arith.constant 1.600000e+01 : f32
    %89 = vector.broadcast %cst_39 : f32 to vector<1x8xf32>
    %90 = arith.divf %88, %89 : vector<1x8xf32>
    %91 = arith.mulf %84, %84 : vector<16x8xf32>
    %cst_40 = arith.constant dense<0.000000e+00> : vector<8xf32>
    %92 = vector.multi_reduction <add>, %91, %cst_40 [0] : vector<16x8xf32> to vector<8xf32>
    %93 = vector.shape_cast %92 : vector<8xf32> to vector<1x8xf32>
    %cst_41 = arith.constant 1.600000e+01 : f32
    %94 = vector.broadcast %cst_41 : f32 to vector<1x8xf32>
    %95 = arith.divf %93, %94 : vector<1x8xf32>
    %96 = arith.mulf %90, %90 : vector<1x8xf32>
    %97 = arith.subf %95, %96 : vector<1x8xf32>
    %cst_42 = arith.constant 0.000000e+00 : f32
    %98 = vector.broadcast %cst_42 : f32 to vector<1x8xf32>
    %99 = arith.maximumf %97, %98 : vector<1x8xf32>
    %cst_43 = arith.constant 9.99999974E-6 : f32
    %100 = vector.broadcast %cst_43 : f32 to vector<1x8xf32>
    %101 = arith.addf %99, %100 : vector<1x8xf32>
    %102 = math.rsqrt %101 : vector<1x8xf32>
    %103 = arith.mulf %102, %85 : vector<1x8xf32>
    %104 = arith.mulf %90, %103 : vector<1x8xf32>
    %105 = arith.subf %86, %104 : vector<1x8xf32>
    %106 = vector.broadcast %103 : vector<1x8xf32> to vector<16x8xf32>
    %107 = arith.mulf %84, %106 : vector<16x8xf32>
    %108 = vector.broadcast %105 : vector<1x8xf32> to vector<16x8xf32>
    %109 = arith.addf %107, %108 : vector<16x8xf32>
    %cst_44 = arith.constant 0.000000e+00 : f32
    %110 = vector.broadcast %cst_44 : f32 to vector<16x8xf32>
    %111 = arith.maximumf %109, %110 : vector<16x8xf32>
    %112 = arith.truncf %111 : vector<16x8xf32> to vector<16x8xbf16>
    %c144 = arith.constant 144 : index
    %c0_45 = arith.constant 0 : index
    %113 = vector.load %arg4[%c144, %c0_45] : memref<584x128xf32, #tpu.memory_space<vmem>>, vector<8x16xf32>
    %114 = arith.truncf %113 : vector<8x16xf32> to vector<8x16xbf16>
    %cst_46 = arith.constant dense<0.000000e+00> : vector<16x16xf32>
    %115 = tpu.matmul %112, %114, %cst_46 {dimension_numbers = #tpu.dot_dimension_numbers<[1], [0], [0], [1], [0, 0, 1, 1], [], []>} : vector<16x8xbf16>, vector<8x16xbf16>, vector<16x16xf32> -> vector<16x16xf32>
    %cst_47 = arith.constant dense<0.000000e+00> : vector<16x8xf32>
    %116 = tpu.matmul %0, %112, %cst_47 {dimension_numbers = #tpu.dot_dimension_numbers<[1], [0], [0], [1], [0, 0, 1, 1], [], []>} : vector<16x16xbf16>, vector<16x8xbf16>, vector<16x8xf32> -> vector<16x8xf32>
    %117 = arith.truncf %116 : vector<16x8xf32> to vector<16x8xbf16>
    %c152 = arith.constant 152 : index
    %c0_48 = arith.constant 0 : index
    %118 = vector.load %arg4[%c152, %c0_48] : memref<584x128xf32, #tpu.memory_space<vmem>>, vector<8x16xf32>
    %119 = arith.truncf %118 : vector<8x16xf32> to vector<8x16xbf16>
    %cst_49 = arith.constant dense<0.000000e+00> : vector<16x16xf32>
    %120 = tpu.matmul %117, %119, %cst_49 {dimension_numbers = #tpu.dot_dimension_numbers<[1], [0], [0], [1], [0, 0, 1, 1], [], []>} : vector<16x8xbf16>, vector<8x16xbf16>, vector<16x16xf32> -> vector<16x16xf32>
    %121 = arith.addf %115, %120 : vector<16x16xf32>
    %c160 = arith.constant 160 : index
    %c0_50 = arith.constant 0 : index
    %122 = vector.load %arg4[%c160, %c0_50] : memref<584x128xf32, #tpu.memory_space<vmem>>, vector<1x16xf32>
    %c161 = arith.constant 161 : index
    %c0_51 = arith.constant 0 : index
    %123 = vector.load %arg4[%c161, %c0_51] : memref<584x128xf32, #tpu.memory_space<vmem>>, vector<1x16xf32>
    %cst_52 = arith.constant dense<0.000000e+00> : vector<16xf32>
    %124 = vector.multi_reduction <add>, %121, %cst_52 [0] : vector<16x16xf32> to vector<16xf32>
    %125 = vector.shape_cast %124 : vector<16xf32> to vector<1x16xf32>
    %cst_53 = arith.constant 1.600000e+01 : f32
    %126 = vector.broadcast %cst_53 : f32 to vector<1x16xf32>
    %127 = arith.divf %125, %126 : vector<1x16xf32>
    %128 = arith.mulf %121, %121 : vector<16x16xf32>
    %cst_54 = arith.constant dense<0.000000e+00> : vector<16xf32>
    %129 = vector.multi_reduction <add>, %128, %cst_54 [0] : vector<16x16xf32> to vector<16xf32>
    %130 = vector.shape_cast %129 : vector<16xf32> to vector<1x16xf32>
    %cst_55 = arith.constant 1.600000e+01 : f32
    %131 = vector.broadcast %cst_55 : f32 to vector<1x16xf32>
    %132 = arith.divf %130, %131 : vector<1x16xf32>
    %133 = arith.mulf %127, %127 : vector<1x16xf32>
    %134 = arith.subf %132, %133 : vector<1x16xf32>
    %cst_56 = arith.constant 0.000000e+00 : f32
    %135 = vector.broadcast %cst_56 : f32 to vector<1x16xf32>
    %136 = arith.maximumf %134, %135 : vector<1x16xf32>
    %cst_57 = arith.constant 9.99999974E-6 : f32
    %137 = vector.broadcast %cst_57 : f32 to vector<1x16xf32>
    %138 = arith.addf %136, %137 : vector<1x16xf32>
    %139 = math.rsqrt %138 : vector<1x16xf32>
    %140 = arith.mulf %139, %122 : vector<1x16xf32>
    %141 = arith.mulf %127, %140 : vector<1x16xf32>
    %142 = arith.subf %123, %141 : vector<1x16xf32>
    %143 = vector.broadcast %140 : vector<1x16xf32> to vector<16x16xf32>
    %144 = arith.mulf %121, %143 : vector<16x16xf32>
    %145 = vector.broadcast %142 : vector<1x16xf32> to vector<16x16xf32>
    %146 = arith.addf %144, %145 : vector<16x16xf32>
    %cst_58 = arith.constant 0.000000e+00 : f32
    %147 = vector.broadcast %cst_58 : f32 to vector<16x16xf32>
    %148 = arith.maximumf %146, %147 : vector<16x16xf32>
    %149 = arith.truncf %148 : vector<16x16xf32> to vector<16x16xbf16>
    %c168 = arith.constant 168 : index
    %c0_59 = arith.constant 0 : index
    %150 = vector.load %arg4[%c168, %c0_59] : memref<584x128xf32, #tpu.memory_space<vmem>>, vector<16x8xf32>
    %151 = arith.truncf %150 : vector<16x8xf32> to vector<16x8xbf16>
    %cst_60 = arith.constant dense<0.000000e+00> : vector<16x8xf32>
    %152 = tpu.matmul %149, %151, %cst_60 {dimension_numbers = #tpu.dot_dimension_numbers<[1], [0], [0], [1], [0, 0, 1, 1], [], []>} : vector<16x16xbf16>, vector<16x8xbf16>, vector<16x8xf32> -> vector<16x8xf32>
    %c184 = arith.constant 184 : index
    %c0_61 = arith.constant 0 : index
    %153 = vector.load %arg4[%c184, %c0_61] : memref<584x128xf32, #tpu.memory_space<vmem>>, vector<16x8xf32>
    %154 = arith.truncf %153 : vector<16x8xf32> to vector<16x8xbf16>
    %cst_62 = arith.constant dense<0.000000e+00> : vector<16x8xf32>
    %155 = tpu.matmul %149, %154, %cst_62 {dimension_numbers = #tpu.dot_dimension_numbers<[1], [0], [0], [1], [0, 0, 1, 1], [], []>} : vector<16x16xbf16>, vector<16x8xbf16>, vector<16x8xf32> -> vector<16x8xf32>
    %156 = arith.truncf %155 : vector<16x8xf32> to vector<16x8xbf16>
    %cst_63 = arith.constant dense<0.000000e+00> : vector<16x8xf32>
    %157 = tpu.matmul %0, %156, %cst_63 {dimension_numbers = #tpu.dot_dimension_numbers<[1], [0], [0], [1], [0, 0, 1, 1], [], []>} : vector<16x16xbf16>, vector<16x8xbf16>, vector<16x8xf32> -> vector<16x8xf32>
    %158 = arith.addf %152, %157 : vector<16x8xf32>
    %c200 = arith.constant 200 : index
    %c0_64 = arith.constant 0 : index
    %159 = vector.load %arg4[%c200, %c0_64] : memref<584x128xf32, #tpu.memory_space<vmem>>, vector<1x8xf32>
    %c201 = arith.constant 201 : index
    %c0_65 = arith.constant 0 : index
    %160 = vector.load %arg4[%c201, %c0_65] : memref<584x128xf32, #tpu.memory_space<vmem>>, vector<1x8xf32>
    %cst_66 = arith.constant dense<0.000000e+00> : vector<8xf32>
    %161 = vector.multi_reduction <add>, %158, %cst_66 [0] : vector<16x8xf32> to vector<8xf32>
    %162 = vector.shape_cast %161 : vector<8xf32> to vector<1x8xf32>
    %cst_67 = arith.constant 1.600000e+01 : f32
    %163 = vector.broadcast %cst_67 : f32 to vector<1x8xf32>
    %164 = arith.divf %162, %163 : vector<1x8xf32>
    %165 = arith.mulf %158, %158 : vector<16x8xf32>
    %cst_68 = arith.constant dense<0.000000e+00> : vector<8xf32>
    %166 = vector.multi_reduction <add>, %165, %cst_68 [0] : vector<16x8xf32> to vector<8xf32>
    %167 = vector.shape_cast %166 : vector<8xf32> to vector<1x8xf32>
    %cst_69 = arith.constant 1.600000e+01 : f32
    %168 = vector.broadcast %cst_69 : f32 to vector<1x8xf32>
    %169 = arith.divf %167, %168 : vector<1x8xf32>
    %170 = arith.mulf %164, %164 : vector<1x8xf32>
    %171 = arith.subf %169, %170 : vector<1x8xf32>
    %cst_70 = arith.constant 0.000000e+00 : f32
    %172 = vector.broadcast %cst_70 : f32 to vector<1x8xf32>
    %173 = arith.maximumf %171, %172 : vector<1x8xf32>
    %cst_71 = arith.constant 9.99999974E-6 : f32
    %174 = vector.broadcast %cst_71 : f32 to vector<1x8xf32>
    %175 = arith.addf %173, %174 : vector<1x8xf32>
    %176 = math.rsqrt %175 : vector<1x8xf32>
    %177 = arith.mulf %176, %159 : vector<1x8xf32>
    %178 = arith.mulf %164, %177 : vector<1x8xf32>
    %179 = arith.subf %160, %178 : vector<1x8xf32>
    %180 = vector.broadcast %177 : vector<1x8xf32> to vector<16x8xf32>
    %181 = arith.mulf %158, %180 : vector<16x8xf32>
    %182 = vector.broadcast %179 : vector<1x8xf32> to vector<16x8xf32>
    %183 = arith.addf %181, %182 : vector<16x8xf32>
    %cst_72 = arith.constant 0.000000e+00 : f32
    %184 = vector.broadcast %cst_72 : f32 to vector<16x8xf32>
    %185 = arith.maximumf %183, %184 : vector<16x8xf32>
    %186 = arith.truncf %185 : vector<16x8xf32> to vector<16x8xbf16>
    %c208 = arith.constant 208 : index
    %c0_73 = arith.constant 0 : index
    %187 = vector.load %arg4[%c208, %c0_73] : memref<584x128xf32, #tpu.memory_space<vmem>>, vector<32x24xf32>
    %188 = arith.truncf %187 : vector<32x24xf32> to vector<32x24xbf16>
    %cst_74 = arith.constant dense<0.000000e+00> : vector<16x24xf32>
    %189 = tpu.matmul %38, %188, %cst_74 {dimension_numbers = #tpu.dot_dimension_numbers<[1], [0], [0], [1], [0, 0, 1, 1], [], []>} : vector<16x32xbf16>, vector<32x24xbf16>, vector<16x24xf32> -> vector<16x24xf32>
    %c240 = arith.constant 240 : index
    %c0_75 = arith.constant 0 : index
    %190 = vector.load %arg4[%c240, %c0_75] : memref<584x128xf32, #tpu.memory_space<vmem>>, vector<8x24xf32>
    %191 = arith.truncf %190 : vector<8x24xf32> to vector<8x24xbf16>
    %cst_76 = arith.constant dense<0.000000e+00> : vector<16x24xf32>
    %192 = tpu.matmul %112, %191, %cst_76 {dimension_numbers = #tpu.dot_dimension_numbers<[1], [0], [0], [1], [0, 0, 1, 1], [], []>} : vector<16x8xbf16>, vector<8x24xbf16>, vector<16x24xf32> -> vector<16x24xf32>
    %193 = arith.addf %189, %192 : vector<16x24xf32>
    %c248 = arith.constant 248 : index
    %c0_77 = arith.constant 0 : index
    %194 = vector.load %arg4[%c248, %c0_77] : memref<584x128xf32, #tpu.memory_space<vmem>>, vector<8x24xf32>
    %195 = arith.truncf %194 : vector<8x24xf32> to vector<8x24xbf16>
    %cst_78 = arith.constant dense<0.000000e+00> : vector<16x24xf32>
    %196 = tpu.matmul %186, %195, %cst_78 {dimension_numbers = #tpu.dot_dimension_numbers<[1], [0], [0], [1], [0, 0, 1, 1], [], []>} : vector<16x8xbf16>, vector<8x24xbf16>, vector<16x24xf32> -> vector<16x24xf32>
    %197 = arith.addf %193, %196 : vector<16x24xf32>
    %c256 = arith.constant 256 : index
    %c0_79 = arith.constant 0 : index
    %198 = vector.load %arg4[%c256, %c0_79] : memref<584x128xf32, #tpu.memory_space<vmem>>, vector<32x24xf32>
    %199 = arith.truncf %198 : vector<32x24xf32> to vector<32x24xbf16>
    %cst_80 = arith.constant dense<0.000000e+00> : vector<16x24xf32>
    %200 = tpu.matmul %38, %199, %cst_80 {dimension_numbers = #tpu.dot_dimension_numbers<[1], [0], [0], [1], [0, 0, 1, 1], [], []>} : vector<16x32xbf16>, vector<32x24xbf16>, vector<16x24xf32> -> vector<16x24xf32>
    %c288 = arith.constant 288 : index
    %c0_81 = arith.constant 0 : index
    %201 = vector.load %arg4[%c288, %c0_81] : memref<584x128xf32, #tpu.memory_space<vmem>>, vector<8x24xf32>
    %202 = arith.truncf %201 : vector<8x24xf32> to vector<8x24xbf16>
    %cst_82 = arith.constant dense<0.000000e+00> : vector<16x24xf32>
    %203 = tpu.matmul %112, %202, %cst_82 {dimension_numbers = #tpu.dot_dimension_numbers<[1], [0], [0], [1], [0, 0, 1, 1], [], []>} : vector<16x8xbf16>, vector<8x24xbf16>, vector<16x24xf32> -> vector<16x24xf32>
    %204 = arith.addf %200, %203 : vector<16x24xf32>
    %c296 = arith.constant 296 : index
    %c0_83 = arith.constant 0 : index
    %205 = vector.load %arg4[%c296, %c0_83] : memref<584x128xf32, #tpu.memory_space<vmem>>, vector<8x24xf32>
    %206 = arith.truncf %205 : vector<8x24xf32> to vector<8x24xbf16>
    %cst_84 = arith.constant dense<0.000000e+00> : vector<16x24xf32>
    %207 = tpu.matmul %186, %206, %cst_84 {dimension_numbers = #tpu.dot_dimension_numbers<[1], [0], [0], [1], [0, 0, 1, 1], [], []>} : vector<16x8xbf16>, vector<8x24xbf16>, vector<16x24xf32> -> vector<16x24xf32>
    %208 = arith.addf %204, %207 : vector<16x24xf32>
    %209 = arith.truncf %208 : vector<16x24xf32> to vector<16x24xbf16>
    %cst_85 = arith.constant dense<0.000000e+00> : vector<16x24xf32>
    %210 = tpu.matmul %0, %209, %cst_85 {dimension_numbers = #tpu.dot_dimension_numbers<[1], [0], [0], [1], [0, 0, 1, 1], [], []>} : vector<16x16xbf16>, vector<16x24xbf16>, vector<16x24xf32> -> vector<16x24xf32>
    %211 = arith.addf %197, %210 : vector<16x24xf32>
    %c304 = arith.constant 304 : index
    %c0_86 = arith.constant 0 : index
    %212 = vector.load %arg4[%c304, %c0_86] : memref<584x128xf32, #tpu.memory_space<vmem>>, vector<1x24xf32>
    %c305 = arith.constant 305 : index
    %c0_87 = arith.constant 0 : index
    %213 = vector.load %arg4[%c305, %c0_87] : memref<584x128xf32, #tpu.memory_space<vmem>>, vector<1x24xf32>
    %cst_88 = arith.constant dense<0.000000e+00> : vector<24xf32>
    %214 = vector.multi_reduction <add>, %211, %cst_88 [0] : vector<16x24xf32> to vector<24xf32>
    %215 = vector.shape_cast %214 : vector<24xf32> to vector<1x24xf32>
    %cst_89 = arith.constant 1.600000e+01 : f32
    %216 = vector.broadcast %cst_89 : f32 to vector<1x24xf32>
    %217 = arith.divf %215, %216 : vector<1x24xf32>
    %218 = arith.mulf %211, %211 : vector<16x24xf32>
    %cst_90 = arith.constant dense<0.000000e+00> : vector<24xf32>
    %219 = vector.multi_reduction <add>, %218, %cst_90 [0] : vector<16x24xf32> to vector<24xf32>
    %220 = vector.shape_cast %219 : vector<24xf32> to vector<1x24xf32>
    %cst_91 = arith.constant 1.600000e+01 : f32
    %221 = vector.broadcast %cst_91 : f32 to vector<1x24xf32>
    %222 = arith.divf %220, %221 : vector<1x24xf32>
    %223 = arith.mulf %217, %217 : vector<1x24xf32>
    %224 = arith.subf %222, %223 : vector<1x24xf32>
    %cst_92 = arith.constant 0.000000e+00 : f32
    %225 = vector.broadcast %cst_92 : f32 to vector<1x24xf32>
    %226 = arith.maximumf %224, %225 : vector<1x24xf32>
    %cst_93 = arith.constant 9.99999974E-6 : f32
    %227 = vector.broadcast %cst_93 : f32 to vector<1x24xf32>
    %228 = arith.addf %226, %227 : vector<1x24xf32>
    %229 = math.rsqrt %228 : vector<1x24xf32>
    %230 = arith.mulf %229, %212 : vector<1x24xf32>
    %231 = arith.mulf %217, %230 : vector<1x24xf32>
    %232 = arith.subf %213, %231 : vector<1x24xf32>
    %233 = vector.broadcast %230 : vector<1x24xf32> to vector<16x24xf32>
    %234 = arith.mulf %211, %233 : vector<16x24xf32>
    %235 = vector.broadcast %232 : vector<1x24xf32> to vector<16x24xf32>
    %236 = arith.addf %234, %235 : vector<16x24xf32>
    %cst_94 = arith.constant 0.000000e+00 : f32
    %237 = vector.broadcast %cst_94 : f32 to vector<16x24xf32>
    %238 = arith.maximumf %236, %237 : vector<16x24xf32>
    %239 = arith.truncf %238 : vector<16x24xf32> to vector<16x24xbf16>
    %c312 = arith.constant 312 : index
    %c0_95 = arith.constant 0 : index
    %240 = vector.load %arg4[%c312, %c0_95] : memref<584x128xf32, #tpu.memory_space<vmem>>, vector<24x16xf32>
    %241 = arith.truncf %240 : vector<24x16xf32> to vector<24x16xbf16>
    %cst_96 = arith.constant dense<0.000000e+00> : vector<16x16xf32>
    %242 = tpu.matmul %239, %241, %cst_96 {dimension_numbers = #tpu.dot_dimension_numbers<[1], [0], [0], [1], [0, 0, 1, 1], [], []>} : vector<16x24xbf16>, vector<24x16xbf16>, vector<16x16xf32> -> vector<16x16xf32>
    %c336 = arith.constant 336 : index
    %c0_97 = arith.constant 0 : index
    %243 = vector.load %arg4[%c336, %c0_97] : memref<584x128xf32, #tpu.memory_space<vmem>>, vector<24x16xf32>
    %244 = arith.truncf %243 : vector<24x16xf32> to vector<24x16xbf16>
    %cst_98 = arith.constant dense<0.000000e+00> : vector<16x16xf32>
    %245 = tpu.matmul %239, %244, %cst_98 {dimension_numbers = #tpu.dot_dimension_numbers<[1], [0], [0], [1], [0, 0, 1, 1], [], []>} : vector<16x24xbf16>, vector<24x16xbf16>, vector<16x16xf32> -> vector<16x16xf32>
    %246 = arith.truncf %245 : vector<16x16xf32> to vector<16x16xbf16>
    %cst_99 = arith.constant dense<0.000000e+00> : vector<16x16xf32>
    %247 = tpu.matmul %0, %246, %cst_99 {dimension_numbers = #tpu.dot_dimension_numbers<[1], [0], [0], [1], [0, 0, 1, 1], [], []>} : vector<16x16xbf16>, vector<16x16xbf16>, vector<16x16xf32> -> vector<16x16xf32>
    %248 = arith.addf %242, %247 : vector<16x16xf32>
    %c360 = arith.constant 360 : index
    %c0_100 = arith.constant 0 : index
    %249 = vector.load %arg4[%c360, %c0_100] : memref<584x128xf32, #tpu.memory_space<vmem>>, vector<1x16xf32>
    %c361 = arith.constant 361 : index
    %c0_101 = arith.constant 0 : index
    %250 = vector.load %arg4[%c361, %c0_101] : memref<584x128xf32, #tpu.memory_space<vmem>>, vector<1x16xf32>
    %cst_102 = arith.constant dense<0.000000e+00> : vector<16xf32>
    %251 = vector.multi_reduction <add>, %248, %cst_102 [0] : vector<16x16xf32> to vector<16xf32>
    %252 = vector.shape_cast %251 : vector<16xf32> to vector<1x16xf32>
    %cst_103 = arith.constant 1.600000e+01 : f32
    %253 = vector.broadcast %cst_103 : f32 to vector<1x16xf32>
    %254 = arith.divf %252, %253 : vector<1x16xf32>
    %255 = arith.mulf %248, %248 : vector<16x16xf32>
    %cst_104 = arith.constant dense<0.000000e+00> : vector<16xf32>
    %256 = vector.multi_reduction <add>, %255, %cst_104 [0] : vector<16x16xf32> to vector<16xf32>
    %257 = vector.shape_cast %256 : vector<16xf32> to vector<1x16xf32>
    %cst_105 = arith.constant 1.600000e+01 : f32
    %258 = vector.broadcast %cst_105 : f32 to vector<1x16xf32>
    %259 = arith.divf %257, %258 : vector<1x16xf32>
    %260 = arith.mulf %254, %254 : vector<1x16xf32>
    %261 = arith.subf %259, %260 : vector<1x16xf32>
    %cst_106 = arith.constant 0.000000e+00 : f32
    %262 = vector.broadcast %cst_106 : f32 to vector<1x16xf32>
    %263 = arith.maximumf %261, %262 : vector<1x16xf32>
    %cst_107 = arith.constant 9.99999974E-6 : f32
    %264 = vector.broadcast %cst_107 : f32 to vector<1x16xf32>
    %265 = arith.addf %263, %264 : vector<1x16xf32>
    %266 = math.rsqrt %265 : vector<1x16xf32>
    %267 = arith.mulf %266, %249 : vector<1x16xf32>
    %268 = arith.mulf %254, %267 : vector<1x16xf32>
    %269 = arith.subf %250, %268 : vector<1x16xf32>
    %270 = vector.broadcast %267 : vector<1x16xf32> to vector<16x16xf32>
    %271 = arith.mulf %248, %270 : vector<16x16xf32>
    %272 = vector.broadcast %269 : vector<1x16xf32> to vector<16x16xf32>
    %273 = arith.addf %271, %272 : vector<16x16xf32>
    %cst_108 = arith.constant 0.000000e+00 : f32
    %274 = vector.broadcast %cst_108 : f32 to vector<16x16xf32>
    %275 = arith.maximumf %273, %274 : vector<16x16xf32>
    %276 = arith.truncf %275 : vector<16x16xf32> to vector<16x16xbf16>
    %c368 = arith.constant 368 : index
    %c0_109 = arith.constant 0 : index
    %277 = vector.load %arg4[%c368, %c0_109] : memref<584x128xf32, #tpu.memory_space<vmem>>, vector<16x8xf32>
    %278 = arith.truncf %277 : vector<16x8xf32> to vector<16x8xbf16>
    %cst_110 = arith.constant dense<0.000000e+00> : vector<16x8xf32>
    %279 = tpu.matmul %276, %278, %cst_110 {dimension_numbers = #tpu.dot_dimension_numbers<[1], [0], [0], [1], [0, 0, 1, 1], [], []>} : vector<16x16xbf16>, vector<16x8xbf16>, vector<16x8xf32> -> vector<16x8xf32>
    %c384 = arith.constant 384 : index
    %c0_111 = arith.constant 0 : index
    %280 = vector.load %arg4[%c384, %c0_111] : memref<584x128xf32, #tpu.memory_space<vmem>>, vector<16x8xf32>
    %281 = arith.truncf %280 : vector<16x8xf32> to vector<16x8xbf16>
    %cst_112 = arith.constant dense<0.000000e+00> : vector<16x8xf32>
    %282 = tpu.matmul %276, %281, %cst_112 {dimension_numbers = #tpu.dot_dimension_numbers<[1], [0], [0], [1], [0, 0, 1, 1], [], []>} : vector<16x16xbf16>, vector<16x8xbf16>, vector<16x8xf32> -> vector<16x8xf32>
    %283 = arith.truncf %282 : vector<16x8xf32> to vector<16x8xbf16>
    %cst_113 = arith.constant dense<0.000000e+00> : vector<16x8xf32>
    %284 = tpu.matmul %0, %283, %cst_113 {dimension_numbers = #tpu.dot_dimension_numbers<[1], [0], [0], [1], [0, 0, 1, 1], [], []>} : vector<16x16xbf16>, vector<16x8xbf16>, vector<16x8xf32> -> vector<16x8xf32>
    %285 = arith.addf %279, %284 : vector<16x8xf32>
    %c400 = arith.constant 400 : index
    %c0_114 = arith.constant 0 : index
    %286 = vector.load %arg4[%c400, %c0_114] : memref<584x128xf32, #tpu.memory_space<vmem>>, vector<1x8xf32>
    %c401 = arith.constant 401 : index
    %c0_115 = arith.constant 0 : index
    %287 = vector.load %arg4[%c401, %c0_115] : memref<584x128xf32, #tpu.memory_space<vmem>>, vector<1x8xf32>
    %cst_116 = arith.constant dense<0.000000e+00> : vector<8xf32>
    %288 = vector.multi_reduction <add>, %285, %cst_116 [0] : vector<16x8xf32> to vector<8xf32>
    %289 = vector.shape_cast %288 : vector<8xf32> to vector<1x8xf32>
    %cst_117 = arith.constant 1.600000e+01 : f32
    %290 = vector.broadcast %cst_117 : f32 to vector<1x8xf32>
    %291 = arith.divf %289, %290 : vector<1x8xf32>
    %292 = arith.mulf %285, %285 : vector<16x8xf32>
    %cst_118 = arith.constant dense<0.000000e+00> : vector<8xf32>
    %293 = vector.multi_reduction <add>, %292, %cst_118 [0] : vector<16x8xf32> to vector<8xf32>
    %294 = vector.shape_cast %293 : vector<8xf32> to vector<1x8xf32>
    %cst_119 = arith.constant 1.600000e+01 : f32
    %295 = vector.broadcast %cst_119 : f32 to vector<1x8xf32>
    %296 = arith.divf %294, %295 : vector<1x8xf32>
    %297 = arith.mulf %291, %291 : vector<1x8xf32>
    %298 = arith.subf %296, %297 : vector<1x8xf32>
    %cst_120 = arith.constant 0.000000e+00 : f32
    %299 = vector.broadcast %cst_120 : f32 to vector<1x8xf32>
    %300 = arith.maximumf %298, %299 : vector<1x8xf32>
    %cst_121 = arith.constant 9.99999974E-6 : f32
    %301 = vector.broadcast %cst_121 : f32 to vector<1x8xf32>
    %302 = arith.addf %300, %301 : vector<1x8xf32>
    %303 = math.rsqrt %302 : vector<1x8xf32>
    %304 = arith.mulf %303, %286 : vector<1x8xf32>
    %305 = arith.mulf %291, %304 : vector<1x8xf32>
    %306 = arith.subf %287, %305 : vector<1x8xf32>
    %307 = vector.broadcast %304 : vector<1x8xf32> to vector<16x8xf32>
    %308 = arith.mulf %285, %307 : vector<16x8xf32>
    %309 = vector.broadcast %306 : vector<1x8xf32> to vector<16x8xf32>
    %310 = arith.addf %308, %309 : vector<16x8xf32>
    %cst_122 = arith.constant 0.000000e+00 : f32
    %311 = vector.broadcast %cst_122 : f32 to vector<16x8xf32>
    %312 = arith.maximumf %310, %311 : vector<16x8xf32>
    %313 = arith.truncf %312 : vector<16x8xf32> to vector<16x8xbf16>
    %c408 = arith.constant 408 : index
    %c0_123 = arith.constant 0 : index
    %314 = vector.load %arg4[%c408, %c0_123] : memref<584x128xf32, #tpu.memory_space<vmem>>, vector<8x16xf32>
    %315 = arith.truncf %314 : vector<8x16xf32> to vector<8x16xbf16>
    %cst_124 = arith.constant dense<0.000000e+00> : vector<16x16xf32>
    %316 = tpu.matmul %313, %315, %cst_124 {dimension_numbers = #tpu.dot_dimension_numbers<[1], [0], [0], [1], [0, 0, 1, 1], [], []>} : vector<16x8xbf16>, vector<8x16xbf16>, vector<16x16xf32> -> vector<16x16xf32>
    %cst_125 = arith.constant dense<0.000000e+00> : vector<16x8xf32>
    %317 = tpu.matmul %0, %313, %cst_125 {dimension_numbers = #tpu.dot_dimension_numbers<[1], [0], [0], [1], [0, 0, 1, 1], [], []>} : vector<16x16xbf16>, vector<16x8xbf16>, vector<16x8xf32> -> vector<16x8xf32>
    %318 = arith.truncf %317 : vector<16x8xf32> to vector<16x8xbf16>
    %c416 = arith.constant 416 : index
    %c0_126 = arith.constant 0 : index
    %319 = vector.load %arg4[%c416, %c0_126] : memref<584x128xf32, #tpu.memory_space<vmem>>, vector<8x16xf32>
    %320 = arith.truncf %319 : vector<8x16xf32> to vector<8x16xbf16>
    %cst_127 = arith.constant dense<0.000000e+00> : vector<16x16xf32>
    %321 = tpu.matmul %318, %320, %cst_127 {dimension_numbers = #tpu.dot_dimension_numbers<[1], [0], [0], [1], [0, 0, 1, 1], [], []>} : vector<16x8xbf16>, vector<8x16xbf16>, vector<16x16xf32> -> vector<16x16xf32>
    %322 = arith.addf %316, %321 : vector<16x16xf32>
    %c424 = arith.constant 424 : index
    %c0_128 = arith.constant 0 : index
    %323 = vector.load %arg4[%c424, %c0_128] : memref<584x128xf32, #tpu.memory_space<vmem>>, vector<1x16xf32>
    %c425 = arith.constant 425 : index
    %c0_129 = arith.constant 0 : index
    %324 = vector.load %arg4[%c425, %c0_129] : memref<584x128xf32, #tpu.memory_space<vmem>>, vector<1x16xf32>
    %cst_130 = arith.constant dense<0.000000e+00> : vector<16xf32>
    %325 = vector.multi_reduction <add>, %322, %cst_130 [0] : vector<16x16xf32> to vector<16xf32>
    %326 = vector.shape_cast %325 : vector<16xf32> to vector<1x16xf32>
    %cst_131 = arith.constant 1.600000e+01 : f32
    %327 = vector.broadcast %cst_131 : f32 to vector<1x16xf32>
    %328 = arith.divf %326, %327 : vector<1x16xf32>
    %329 = arith.mulf %322, %322 : vector<16x16xf32>
    %cst_132 = arith.constant dense<0.000000e+00> : vector<16xf32>
    %330 = vector.multi_reduction <add>, %329, %cst_132 [0] : vector<16x16xf32> to vector<16xf32>
    %331 = vector.shape_cast %330 : vector<16xf32> to vector<1x16xf32>
    %cst_133 = arith.constant 1.600000e+01 : f32
    %332 = vector.broadcast %cst_133 : f32 to vector<1x16xf32>
    %333 = arith.divf %331, %332 : vector<1x16xf32>
    %334 = arith.mulf %328, %328 : vector<1x16xf32>
    %335 = arith.subf %333, %334 : vector<1x16xf32>
    %cst_134 = arith.constant 0.000000e+00 : f32
    %336 = vector.broadcast %cst_134 : f32 to vector<1x16xf32>
    %337 = arith.maximumf %335, %336 : vector<1x16xf32>
    %cst_135 = arith.constant 9.99999974E-6 : f32
    %338 = vector.broadcast %cst_135 : f32 to vector<1x16xf32>
    %339 = arith.addf %337, %338 : vector<1x16xf32>
    %340 = math.rsqrt %339 : vector<1x16xf32>
    %341 = arith.mulf %340, %323 : vector<1x16xf32>
    %342 = arith.mulf %328, %341 : vector<1x16xf32>
    %343 = arith.subf %324, %342 : vector<1x16xf32>
    %344 = vector.broadcast %341 : vector<1x16xf32> to vector<16x16xf32>
    %345 = arith.mulf %322, %344 : vector<16x16xf32>
    %346 = vector.broadcast %343 : vector<1x16xf32> to vector<16x16xf32>
    %347 = arith.addf %345, %346 : vector<16x16xf32>
    %cst_136 = arith.constant 0.000000e+00 : f32
    %348 = vector.broadcast %cst_136 : f32 to vector<16x16xf32>
    %349 = arith.maximumf %347, %348 : vector<16x16xf32>
    %350 = arith.truncf %349 : vector<16x16xf32> to vector<16x16xbf16>
    %c432 = arith.constant 432 : index
    %c0_137 = arith.constant 0 : index
    %351 = vector.load %arg4[%c432, %c0_137] : memref<584x128xf32, #tpu.memory_space<vmem>>, vector<16x8xf32>
    %352 = arith.truncf %351 : vector<16x8xf32> to vector<16x8xbf16>
    %cst_138 = arith.constant dense<0.000000e+00> : vector<16x8xf32>
    %353 = tpu.matmul %350, %352, %cst_138 {dimension_numbers = #tpu.dot_dimension_numbers<[1], [0], [0], [1], [0, 0, 1, 1], [], []>} : vector<16x16xbf16>, vector<16x8xbf16>, vector<16x8xf32> -> vector<16x8xf32>
    %c448 = arith.constant 448 : index
    %c0_139 = arith.constant 0 : index
    %354 = vector.load %arg4[%c448, %c0_139] : memref<584x128xf32, #tpu.memory_space<vmem>>, vector<16x8xf32>
    %355 = arith.truncf %354 : vector<16x8xf32> to vector<16x8xbf16>
    %cst_140 = arith.constant dense<0.000000e+00> : vector<16x8xf32>
    %356 = tpu.matmul %350, %355, %cst_140 {dimension_numbers = #tpu.dot_dimension_numbers<[1], [0], [0], [1], [0, 0, 1, 1], [], []>} : vector<16x16xbf16>, vector<16x8xbf16>, vector<16x8xf32> -> vector<16x8xf32>
    %357 = arith.truncf %356 : vector<16x8xf32> to vector<16x8xbf16>
    %cst_141 = arith.constant dense<0.000000e+00> : vector<16x8xf32>
    %358 = tpu.matmul %0, %357, %cst_141 {dimension_numbers = #tpu.dot_dimension_numbers<[1], [0], [0], [1], [0, 0, 1, 1], [], []>} : vector<16x16xbf16>, vector<16x8xbf16>, vector<16x8xf32> -> vector<16x8xf32>
    %359 = arith.addf %353, %358 : vector<16x8xf32>
    %c464 = arith.constant 464 : index
    %c0_142 = arith.constant 0 : index
    %360 = vector.load %arg4[%c464, %c0_142] : memref<584x128xf32, #tpu.memory_space<vmem>>, vector<1x8xf32>
    %c465 = arith.constant 465 : index
    %c0_143 = arith.constant 0 : index
    %361 = vector.load %arg4[%c465, %c0_143] : memref<584x128xf32, #tpu.memory_space<vmem>>, vector<1x8xf32>
    %cst_144 = arith.constant dense<0.000000e+00> : vector<8xf32>
    %362 = vector.multi_reduction <add>, %359, %cst_144 [0] : vector<16x8xf32> to vector<8xf32>
    %363 = vector.shape_cast %362 : vector<8xf32> to vector<1x8xf32>
    %cst_145 = arith.constant 1.600000e+01 : f32
    %364 = vector.broadcast %cst_145 : f32 to vector<1x8xf32>
    %365 = arith.divf %363, %364 : vector<1x8xf32>
    %366 = arith.mulf %359, %359 : vector<16x8xf32>
    %cst_146 = arith.constant dense<0.000000e+00> : vector<8xf32>
    %367 = vector.multi_reduction <add>, %366, %cst_146 [0] : vector<16x8xf32> to vector<8xf32>
    %368 = vector.shape_cast %367 : vector<8xf32> to vector<1x8xf32>
    %cst_147 = arith.constant 1.600000e+01 : f32
    %369 = vector.broadcast %cst_147 : f32 to vector<1x8xf32>
    %370 = arith.divf %368, %369 : vector<1x8xf32>
    %371 = arith.mulf %365, %365 : vector<1x8xf32>
    %372 = arith.subf %370, %371 : vector<1x8xf32>
    %cst_148 = arith.constant 0.000000e+00 : f32
    %373 = vector.broadcast %cst_148 : f32 to vector<1x8xf32>
    %374 = arith.maximumf %372, %373 : vector<1x8xf32>
    %cst_149 = arith.constant 9.99999974E-6 : f32
    %375 = vector.broadcast %cst_149 : f32 to vector<1x8xf32>
    %376 = arith.addf %374, %375 : vector<1x8xf32>
    %377 = math.rsqrt %376 : vector<1x8xf32>
    %378 = arith.mulf %377, %360 : vector<1x8xf32>
    %379 = arith.mulf %365, %378 : vector<1x8xf32>
    %380 = arith.subf %361, %379 : vector<1x8xf32>
    %381 = vector.broadcast %378 : vector<1x8xf32> to vector<16x8xf32>
    %382 = arith.mulf %359, %381 : vector<16x8xf32>
    %383 = vector.broadcast %380 : vector<1x8xf32> to vector<16x8xf32>
    %384 = arith.addf %382, %383 : vector<16x8xf32>
    %cst_150 = arith.constant 0.000000e+00 : f32
    %385 = vector.broadcast %cst_150 : f32 to vector<16x8xf32>
    %386 = arith.maximumf %384, %385 : vector<16x8xf32>
    %387 = arith.truncf %386 : vector<16x8xf32> to vector<16x8xbf16>
    %c472 = arith.constant 472 : index
    %c0_151 = arith.constant 0 : index
    %388 = vector.load %arg4[%c472, %c0_151] : memref<584x128xf32, #tpu.memory_space<vmem>>, vector<24x20xf32>
    %389 = arith.truncf %388 : vector<24x20xf32> to vector<24x20xbf16>
    %cst_152 = arith.constant dense<0.000000e+00> : vector<16x20xf32>
    %390 = tpu.matmul %239, %389, %cst_152 {dimension_numbers = #tpu.dot_dimension_numbers<[1], [0], [0], [1], [0, 0, 1, 1], [], []>} : vector<16x24xbf16>, vector<24x20xbf16>, vector<16x20xf32> -> vector<16x20xf32>
    %c496 = arith.constant 496 : index
    %c0_153 = arith.constant 0 : index
    %391 = vector.load %arg4[%c496, %c0_153] : memref<584x128xf32, #tpu.memory_space<vmem>>, vector<8x20xf32>
    %392 = arith.truncf %391 : vector<8x20xf32> to vector<8x20xbf16>
    %cst_154 = arith.constant dense<0.000000e+00> : vector<16x20xf32>
    %393 = tpu.matmul %313, %392, %cst_154 {dimension_numbers = #tpu.dot_dimension_numbers<[1], [0], [0], [1], [0, 0, 1, 1], [], []>} : vector<16x8xbf16>, vector<8x20xbf16>, vector<16x20xf32> -> vector<16x20xf32>
    %394 = arith.addf %390, %393 : vector<16x20xf32>
    %c504 = arith.constant 504 : index
    %c0_155 = arith.constant 0 : index
    %395 = vector.load %arg4[%c504, %c0_155] : memref<584x128xf32, #tpu.memory_space<vmem>>, vector<8x20xf32>
    %396 = arith.truncf %395 : vector<8x20xf32> to vector<8x20xbf16>
    %cst_156 = arith.constant dense<0.000000e+00> : vector<16x20xf32>
    %397 = tpu.matmul %387, %396, %cst_156 {dimension_numbers = #tpu.dot_dimension_numbers<[1], [0], [0], [1], [0, 0, 1, 1], [], []>} : vector<16x8xbf16>, vector<8x20xbf16>, vector<16x20xf32> -> vector<16x20xf32>
    %398 = arith.addf %394, %397 : vector<16x20xf32>
    %c512 = arith.constant 512 : index
    %c0_157 = arith.constant 0 : index
    %399 = vector.load %arg4[%c512, %c0_157] : memref<584x128xf32, #tpu.memory_space<vmem>>, vector<24x20xf32>
    %400 = arith.truncf %399 : vector<24x20xf32> to vector<24x20xbf16>
    %cst_158 = arith.constant dense<0.000000e+00> : vector<16x20xf32>
    %401 = tpu.matmul %239, %400, %cst_158 {dimension_numbers = #tpu.dot_dimension_numbers<[1], [0], [0], [1], [0, 0, 1, 1], [], []>} : vector<16x24xbf16>, vector<24x20xbf16>, vector<16x20xf32> -> vector<16x20xf32>
    %c536 = arith.constant 536 : index
    %c0_159 = arith.constant 0 : index
    %402 = vector.load %arg4[%c536, %c0_159] : memref<584x128xf32, #tpu.memory_space<vmem>>, vector<8x20xf32>
    %403 = arith.truncf %402 : vector<8x20xf32> to vector<8x20xbf16>
    %cst_160 = arith.constant dense<0.000000e+00> : vector<16x20xf32>
    %404 = tpu.matmul %313, %403, %cst_160 {dimension_numbers = #tpu.dot_dimension_numbers<[1], [0], [0], [1], [0, 0, 1, 1], [], []>} : vector<16x8xbf16>, vector<8x20xbf16>, vector<16x20xf32> -> vector<16x20xf32>
    %405 = arith.addf %401, %404 : vector<16x20xf32>
    %c544 = arith.constant 544 : index
    %c0_161 = arith.constant 0 : index
    %406 = vector.load %arg4[%c544, %c0_161] : memref<584x128xf32, #tpu.memory_space<vmem>>, vector<8x20xf32>
    %407 = arith.truncf %406 : vector<8x20xf32> to vector<8x20xbf16>
    %cst_162 = arith.constant dense<0.000000e+00> : vector<16x20xf32>
    %408 = tpu.matmul %387, %407, %cst_162 {dimension_numbers = #tpu.dot_dimension_numbers<[1], [0], [0], [1], [0, 0, 1, 1], [], []>} : vector<16x8xbf16>, vector<8x20xbf16>, vector<16x20xf32> -> vector<16x20xf32>
    %409 = arith.addf %405, %408 : vector<16x20xf32>
    %410 = arith.truncf %409 : vector<16x20xf32> to vector<16x20xbf16>
    %cst_163 = arith.constant dense<0.000000e+00> : vector<16x20xf32>
    %411 = tpu.matmul %0, %410, %cst_163 {dimension_numbers = #tpu.dot_dimension_numbers<[1], [0], [0], [1], [0, 0, 1, 1], [], []>} : vector<16x16xbf16>, vector<16x20xbf16>, vector<16x20xf32> -> vector<16x20xf32>
    %412 = arith.addf %398, %411 : vector<16x20xf32>
    %c552 = arith.constant 552 : index
    %c0_164 = arith.constant 0 : index
    %413 = vector.load %arg4[%c552, %c0_164] : memref<584x128xf32, #tpu.memory_space<vmem>>, vector<1x20xf32>
    %c553 = arith.constant 553 : index
    %c0_165 = arith.constant 0 : index
    %414 = vector.load %arg4[%c553, %c0_165] : memref<584x128xf32, #tpu.memory_space<vmem>>, vector<1x20xf32>
    %cst_166 = arith.constant dense<0.000000e+00> : vector<20xf32>
    %415 = vector.multi_reduction <add>, %412, %cst_166 [0] : vector<16x20xf32> to vector<20xf32>
    %416 = vector.shape_cast %415 : vector<20xf32> to vector<1x20xf32>
    %cst_167 = arith.constant 1.600000e+01 : f32
    %417 = vector.broadcast %cst_167 : f32 to vector<1x20xf32>
    %418 = arith.divf %416, %417 : vector<1x20xf32>
    %419 = arith.mulf %412, %412 : vector<16x20xf32>
    %cst_168 = arith.constant dense<0.000000e+00> : vector<20xf32>
    %420 = vector.multi_reduction <add>, %419, %cst_168 [0] : vector<16x20xf32> to vector<20xf32>
    %421 = vector.shape_cast %420 : vector<20xf32> to vector<1x20xf32>
    %cst_169 = arith.constant 1.600000e+01 : f32
    %422 = vector.broadcast %cst_169 : f32 to vector<1x20xf32>
    %423 = arith.divf %421, %422 : vector<1x20xf32>
    %424 = arith.mulf %418, %418 : vector<1x20xf32>
    %425 = arith.subf %423, %424 : vector<1x20xf32>
    %cst_170 = arith.constant 0.000000e+00 : f32
    %426 = vector.broadcast %cst_170 : f32 to vector<1x20xf32>
    %427 = arith.maximumf %425, %426 : vector<1x20xf32>
    %cst_171 = arith.constant 9.99999974E-6 : f32
    %428 = vector.broadcast %cst_171 : f32 to vector<1x20xf32>
    %429 = arith.addf %427, %428 : vector<1x20xf32>
    %430 = math.rsqrt %429 : vector<1x20xf32>
    %431 = arith.mulf %430, %413 : vector<1x20xf32>
    %432 = arith.mulf %418, %431 : vector<1x20xf32>
    %433 = arith.subf %414, %432 : vector<1x20xf32>
    %434 = vector.broadcast %431 : vector<1x20xf32> to vector<16x20xf32>
    %435 = arith.mulf %412, %434 : vector<16x20xf32>
    %436 = vector.broadcast %433 : vector<1x20xf32> to vector<16x20xf32>
    %437 = arith.addf %435, %436 : vector<16x20xf32>
    %cst_172 = arith.constant 0.000000e+00 : f32
    %438 = vector.broadcast %cst_172 : f32 to vector<16x20xf32>
    %439 = arith.maximumf %437, %438 : vector<16x20xf32>
    %440 = arith.truncf %439 : vector<16x20xf32> to vector<16x20xbf16>
    %c560 = arith.constant 560 : index
    %c0_173 = arith.constant 0 : index
    %441 = vector.load %arg4[%c560, %c0_173] : memref<584x128xf32, #tpu.memory_space<vmem>>, vector<20x4xf32>
    %442 = arith.truncf %441 : vector<20x4xf32> to vector<20x4xbf16>
    %c580 = arith.constant 580 : index
    %c0_174 = arith.constant 0 : index
    %443 = vector.load %arg4[%c580, %c0_174] : memref<584x128xf32, #tpu.memory_space<vmem>>, vector<1x4xf32>
    %c0_175 = arith.constant 0 : index
    %c0_176 = arith.constant 0 : index
    %444 = vector.load %arg2[%c0_175, %c0_176] : memref<2x16xbf16, #tpu.memory_space<vmem>>, vector<2x16xbf16>
    %cst_177 = arith.constant dense<0.000000e+00> : vector<2x20xf32>
    %445 = tpu.matmul %444, %440, %cst_177 {dimension_numbers = #tpu.dot_dimension_numbers<[1], [0], [0], [1], [0, 0, 1, 1], [], []>} : vector<2x16xbf16>, vector<16x20xbf16>, vector<2x20xf32> -> vector<2x20xf32>
    %c0_178 = arith.constant 0 : index
    %c0_179 = arith.constant 0 : index
    %446 = vector.load %arg3[%c0_178, %c0_179] : memref<2x1xf32, #tpu.memory_space<vmem>>, vector<2x1xf32>
    %447 = vector.broadcast %446 : vector<2x1xf32> to vector<2x20xf32>
    %448 = arith.mulf %445, %447 : vector<2x20xf32>
    %449 = arith.truncf %448 : vector<2x20xf32> to vector<2x20xbf16>
    %cst_180 = arith.constant dense<0.000000e+00> : vector<2x4xf32>
    %450 = tpu.matmul %449, %442, %cst_180 {dimension_numbers = #tpu.dot_dimension_numbers<[1], [0], [0], [1], [0, 0, 1, 1], [], []>} : vector<2x20xbf16>, vector<20x4xbf16>, vector<2x4xf32> -> vector<2x4xf32>
    %451 = vector.broadcast %443 : vector<1x4xf32> to vector<2x4xf32>
    %452 = arith.addf %450, %451 : vector<2x4xf32>
    %c0_181 = arith.constant 0 : index
    %c0_182 = arith.constant 0 : index
    %453 = vector.load %arg5[%c0_181, %c0_182] : memref<2x4xf32, #tpu.memory_space<vmem>>, vector<2x4xf32>
    tpu.vector_store %arg5[%c0_181, %c0_182], %452 {strides = array<i32>} : memref<2x4xf32, #tpu.memory_space<vmem>>, vector<2x4xf32>,
    return
  }
}

</mosaic_0001>

<bundles_post_ra>
// kernel: tpu_custom_call.1
= control target key start
LH: loop header
LB: loop body
LE: loop exit
PB: predicated region body
PF: predicated region fallthrough
CT: control target
= control target key end

     0   :  { %10 = vsyncpa [#allocation3], 0  ;;  %s1971_s0 = inlined_call_operand.hbm [shape: bf16[16,12], index: 0, kind: input, shape index: {}]   ;;  %s1972_s1 = inlined_call_operand.hbm [shape: bf16[16,16], index: 1, kind: input, shape index: {}]   ;;  %s1973_s2 = inlined_call_operand.vmem [shape: bf16[2,16], index: 2, kind: input, shape index: {}]   ;;  %s1974_s3 = inlined_call_operand.vmem [shape: f32[2,1], index: 3, kind: input, shape index: {}]   ;;  %s1975_s4 = inlined_call_operand.hbm [shape: f32[584,128], index: 4, kind: input, shape index: {}]   ;;  %s1976_s5 = inlined_call_operand.hbm [shape: f32[2,4], index: 5, kind: output, shape index: {}]  }
   0x1   :  { %11 = vsyncpa [#allocation6], 0 }
   0x2   :  { %12 = vsyncpa [#allocation4], 0  ;;  %s30_s20 = sshll.u32 %s1972_s1, 4  ;;  %s1707_s21 = smov [#allocation5]   ;;  %s31_s20 = int_to_ptr.hbm [resolvable:$true] %s30_s20 }
   0x3   :  { %s32_s22 = sshll.u32 %s1707_s21, 4  ;;  %s17_s25 = sshll.u32 %s1971_s0, 4  ;;  %s33_s22 = int_to_ptr.vmem [resolvable:$true] %s32_s22  ;;  %s18_s25 = int_to_ptr.hbm [resolvable:$true] %s17_s25 }
   0x4   :  { %s1708_s26 = smov 64   ;;  %s1709_s27 = smov 4  }
   0x5   :  { %38 = dma.hbm_to_vmem [thread:$0]  %s31_s20, 128, %s33_s22, [#allocation6], %s1708_s26, %s1708_s26, %s1709_s27  }
   0x6   :  { %s1710_s28 = smov [#allocation2]   ;;  %s47_s7 = sshll.u32 %s1975_s4, 4  ;;  %s48_s7 = int_to_ptr.hbm [resolvable:$true] %s47_s7 }
   0x7   :  { %s19_s29 = sshll.u32 %s1710_s28, 4  ;;  %s1711_s1 = smov [#allocation7]   ;;  %s20_s29 = int_to_ptr.vmem [resolvable:$true] %s19_s29 }
   0x8   :  { %25 = dma.hbm_to_vmem [thread:$0]  %s18_s25, 128, %s20_s29, [#allocation3], %s1708_s26, %s1708_s26, %s1709_s27  }
   0x9   :  { %s49_s8 = sshll.u32 %s1711_s1, 4  ;;  %s1712_s9 = smov 128   ;;  %s50_s8 = int_to_ptr.vmem [resolvable:$true] %s49_s8 }
   0xa   :  { %s1713_s10 = smov 8  }
   0xb   :  { %55 = dma.hbm_to_vmem [thread:$0]  %s48_s7, 9344, %s50_s8, [#allocation6], %s1712_s9, %s1712_s9, %s1713_s10  }
   0xc   :  { %1701 = dma.done.wait [#allocation3], 128  }
   0xd   :  { %1702 = vsyncadd [#allocation3], 4294967168 }
   0xe   :  { %1703 = dma.done.wait [#allocation6], 9472  }
   0xf   :  { %1704 = vsyncadd [#allocation6], 4294957824  ;;  %v1567_v0 = vld [vmem:[#allocation2] sm:$0xff]  ;;  %v73_v1 = vld [vmem:[#allocation7] sm:$0xff]  ;;  %vm113_vm0 = vcmask 1045504   ;;  %vm87_vm1 = vcmask 130048  }
  0x10   :  { %v1756_v2 = vld [vmem:[#allocation5] sm:$0xff]  ;;  %v74_v3 = vld [vmem:[#allocation7 + $0x8] sm:$0xf]  ;;  %98 = vmatpush.bf16.msra.mxu0 %v1567_v0  ;;  %vm109_vm2 = vcmask 97280   ;;  %v106_v6 = vld [vmem:[#allocation7 + $0x10] sm:$0xff]  ;;  %v1714_v14 = vmov 16.0  }
  0x11   :  { %v75_v4 = vpack.c.bf16 %v74_v3, %v73_v1  ;;  %v107_v7 = vld [vmem:[#allocation7 + $0x18] sm:$0xf]  ;;  %1580 = vrcp.f32 %v1714_v14  ;;  %vm153_vm3 = vcmask 261120   ;;  %v217_v47 = vld [vmem:[#allocation7 + $0x50] sm:$0xff]  ;;  %v215_v56 = vld [vmem:[#allocation7 + $0x40] sm:$0xff]  ;;  %vm371_vm11 = vcmask 64512  }
  0x12   :  { %v108_v8 = vpack.c.bf16 %v107_v7, %v106_v6  ;;  %v218_v48 = vld [vmem:[#allocation7 + $0x58] sm:$0xff]  ;;  %v211_v49 = vld [vmem:[#allocation7 + $0x30] sm:$0xff]  ;;  %v216_v57 = vld [vmem:[#allocation7 + $0x48] sm:$0xff]  ;;  %vm442_vm12 = vcmask 1043456   ;;  %s1716_s12 = smov [#allocation8]  }
  0x13   :  { %v135_v5 = vsel %vm113_vm0, %v75_v4, 0  ;;  %1523 = vmatmul.msk.bf16.vlgmr.msra.gmra.mxu0 %vm87_vm1, %v1756_v2  ;;  %v220_v50 = vpack.c.bf16 %v218_v48, %v217_v47  ;;  %v212_v51 = vld [vmem:[#allocation7 + $0x38] sm:$0xff]  ;;  %v209_v58 = vld [vmem:[#allocation7 + $0x20] sm:$0xff]  ;;  %v219_v59 = vpack.c.bf16 %v216_v57, %v215_v56  ;;  %v210_v60 = vld [vmem:[#allocation7 + $0x28] sm:$0xff]  ;;  %s1502_s13 = sshll.u32 %s1716_s12, 4  ;;  %s1503_s13 = int_to_ptr.vmem [resolvable:$true] %s1502_s13 }
  0x14   :  { %144 = vmatpush.bf16.msra.mxu2 %v135_v5  ;;  %v115_v9 = vsel %vm113_vm0, %v108_v8, 0  ;;  %v214_v54 = vpack.c.bf16 %v212_v51, %v211_v49  ;;  %v213_v62 = vpack.c.bf16 %v210_v60, %v209_v58  ;;  %v151_v6 = vld [vmem:[#allocation7 + $0x1c] sm:$0x1]  ;;  %v321_v57 = vld [vmem:[#allocation7 + $0x80] sm:$0xff]  ;;  %v317_v58 = vld [vmem:[#allocation7 + $0x68] sm:$0xff] }
  0x15   :  { %124 = vmatpush.bf16.msra.mxu1 %v115_v9  ;;  %230 = vmatpush.bf16.msra.mxu3 %v220_v50  ;;  %v320_v56 = vld [vmem:[#allocation7 + $0x78] sm:$0xff]  ;;  %v318_v60 = vld [vmem:[#allocation7 + $0x70] sm:$0xff] }
  0x17   :  { %1525 = vmatmul.msk.bf16.vlgmr.msra.gmra.mxu2 %vm109_vm2, %v1567_v0  ;;  %v1581_v16 = vpop.eup %1580 }
  0x18   :  { %v164_v18 = vmul.f32 16.0, %v1581_v16  ;;  %vm168_vm4 = vweird.f32 %v1581_v16 }
  0x19   :  { %259 = vmatpush.bf16.msrb.mxu1 %v214_v54  ;;  %231 = vmatpush.bf16.msra.mxu3 %v219_v59  ;;  %v322_v59 = vpack.c.bf16 %v321_v57, %v320_v56  ;;  %v420_v56 = vld [vmem:[#allocation7 + $0x90] sm:$0xff] }
  0x1a   :  { %v165_v25 = vsub.f32 1.0, %v164_v18 }
  0x1b   :  { %333 = vmatpush.bf16.msrb.mxu2 %v322_v59 }
  0x1c   :  { %v166_v32 = vmul.f32 %v1581_v16, %v165_v25 }
  0x1d   :  { %260 = vmatpush.bf16.msrb.mxu1 %v213_v62  ;;  %v319_v62 = vpack.c.bf16 %v318_v60, %v317_v58  ;;  %v421_v58 = vpack.c.bf16 %v420_v56, %v420_v56 }
  0x1e   :  { %v167_v37 = vadd.f32 %v1581_v16, %v166_v32 }
  0x1f   :  { %v464_v60 = vsel %vm442_vm12, %v421_v58, 0 }
  0x20   :  { %v1774_v42 = vsel %vm168_vm4, %v1581_v16, %v167_v37 }
  0x90   :  { %v100_v10 = vpop.f32.mrf.mxu0 }
  0x98   :  { %v102_v11 = vpop.f32.mrf.mxu0 }
  0x99   :  { %v105_v12 = vpack.c.bf16 %v102_v11, %v100_v10  ;;  %v152_v10 = vld [vmem:[#allocation7 + $0x1d] sm:$0x1] }
  0x9a   :  { %v146_v13 = vpop.f32.mrf.mxu2 }
  0x9b   :  { %1524 = vmatmul.msk.bf16.vlgmr.msra.gmra.mxu1 %vm109_vm2, %v105_v12 }
  0xa2   :  { %v148_v19 = vpop.f32.mrf.mxu2 }
 0x118   :  { %v126_v15 = vpop.f32.mrf.mxu1 }
 0x119   :  { %v1760_v17 = vadd.f32 %v146_v13, %v126_v15 }
 0x11b   :  { %v171_v21 = vmul.f32 %v1760_v17, %v1760_v17  ;;  %v154_v23 = vsel %vm153_vm3, %v1760_v17, 0.0 }
 0x11d   :  { %v173_v28 = vsel %vm153_vm3, %v171_v21, 0.0 }
 0x120   :  { %v128_v20 = vpop.f32.mrf.mxu1 }
 0x121   :  { %v1764_v22 = vadd.f32 %v148_v19, %v128_v20 }
 0x123   :  { %v155_v24 = vsel %vm153_vm3, %v1764_v22, 0.0  ;;  %v172_v26 = vmul.f32 %v1764_v22, %v1764_v22 }
 0x124   :  { %v156_v27 = vadd.f32 %v155_v24, %v154_v23 }
 0x125   :  { %v174_v29 = vsel %vm153_vm3, %v172_v26, 0.0 }
 0x126   :  { %v157_v30 = vrot.slane %v156_v27, 4  ;;  %v175_v31 = vadd.f32 %v174_v29, %v173_v28 }
 0x128   :  { %v158_v33 = vadd.f32 %v157_v30, %v156_v27  ;;  %v176_v34 = vrot.slane %v175_v31, 4 }
 0x12a   :  { %v159_v35 = vrot.slane %v158_v33, 2  ;;  %v177_v36 = vadd.f32 %v176_v34, %v175_v31 }
 0x12c   :  { %v160_v38 = vadd.f32 %v159_v35, %v158_v33  ;;  %v178_v39 = vrot.slane %v177_v36, 2 }
 0x12e   :  { %v161_v40 = vrot.slane %v160_v38, 1  ;;  %v179_v41 = vadd.f32 %v178_v39, %v177_v36 }
 0x130   :  { %v162_v43 = vadd.f32 %v161_v40, %v160_v38  ;;  %v180_v44 = vrot.slane %v179_v41, 1 }
 0x132   :  { %v170_v45 = vmul.f32 %v1774_v42, %v162_v43  ;;  %v181_v46 = vadd.f32 %v180_v44, %v179_v41 }
 0x134   :  { %v182_v52 = vmul.f32 %v181_v46, %v1774_v42  ;;  %v183_v53 = vmul.f32 %v170_v45, %v170_v45 }
 0x136   :  { %v184_v55 = vsub.f32 %v182_v52, %v183_v53 }
 0x138   :  { %v185_v61 = vmax.f32 %v184_v55, 0.0 }
 0x13a   :  { %v186_v63 = vadd.f32 1e-05, %v185_v61 }
 0x13c   :  { %1582 = vrsqrt.f32 %v186_v63  ;;  %vm193_vm6 = vweird.f32 %v186_v63 }
 0x142   :  { %v1583_v0 = vpop.eup %1582 }
 0x143   :  { %v188_v1 = vmul.f32 %v1583_v0, %v186_v63  ;;  %vm194_vm5 = vweird.f32 %v1583_v0 }
 0x144   :  { %vm195_vm7 = vmor %vm193_vm6, %vm194_vm5 }
 0x145   :  { %v189_v3 = vmul.f32 %v1583_v0, %v188_v1 }
 0x147   :  { %v190_v4 = vmul.f32 0.5, %v189_v3 }
 0x149   :  { %v191_v5 = vsub.f32 1.5, %v190_v4 }
 0x14b   :  { %v192_v7 = vmul.f32 %v1583_v0, %v191_v5 }
 0x14d   :  { %v196_v8 = vsel %vm195_vm7, %v1583_v0, %v192_v7  ;;  %vm774_vm7 = vcmask 195584  }
 0x14e   :  { %v197_v9 = vmul.f32 %v196_v8, %v151_v6  ;;  %v267_v6 = vld [vmem:[#allocation7 + $0x60] sm:$0x1] }
 0x150   :  { %v198_v11 = vmul.f32 %v197_v9, %v170_v45  ;;  %v200_v12 = vperm.slane %v197_v9, 0 }
 0x152   :  { %v199_v13 = vsub.f32 %v152_v10, %v198_v11  ;;  %v201_v14 = vmul.f32 %v200_v12, %v1760_v17  ;;  %v202_v15 = vmul.f32 %v200_v12, %v1764_v22  ;;  %v268_v10 = vld [vmem:[#allocation7 + $0x61] sm:$0x1] }
 0x154   :  { %v203_v16 = vperm.slane %v199_v13, 0 }
 0x156   :  { %v205_v18 = vadd.f32 %v203_v16, %v202_v15  ;;  %v204_v19 = vadd.f32 %v203_v16, %v201_v14 }
 0x158   :  { %v207_v20 = vmax.f32 %v205_v18, 0.0  ;;  %v206_v21 = vmax.f32 %v204_v19, 0.0 }
 0x15a   :  { %v1780_v23 = vpack.c.bf16 %v207_v20, %v206_v21 }
 0x15c   :  { %1526 = vmatmul.msk.bf16.vlgmr.msra.gmra.mxu3 %vm153_vm3, %v1780_v23  ;;  %1528 = vmatmul.msk.bf16.vlgmr.msrb.gmra.mxu1 %vm153_vm3, %v1780_v23 }
 0x1d9   :  { %v262_v17 = vpop.f32.mrf.mxu1 }
 0x1df   :  { %v233_v24 = vpop.f32.mrf.mxu3 }
 0x1e1   :  { %v264_v28 = vpop.f32.mrf.mxu1 }
 0x1e7   :  { %v235_v25 = vpop.f32.mrf.mxu3 }
 0x1e8   :  { %v238_v26 = vpack.c.bf16 %v235_v25, %v233_v24 }
 0x1ea   :  { %246 = vmatpush.bf16.msrb.mxu0 %v238_v26 }
 0x1ed   :  { %1527 = vmatmul.msk.bf16.vlgmr.msrb.gmra.mxu0 %vm87_vm1, %v1756_v2 }
 0x1ee   :  { %362 = vmatpush.bf16.msra.mxu0 %v319_v62  ;;  %v638_v62 = vld [vmem:[#allocation7 + $0xf0] sm:$0xff] }
 0x26a   :  { %v248_v22 = vpop.f32.mrf.mxu0 }
 0x26b   :  { %v263_v27 = vadd.f32 %v262_v17, %v248_v22 }
 0x26d   :  { %v279_v30 = vmul.f32 %v263_v27, %v263_v27  ;;  %v269_v32 = vsel %vm87_vm1, %v263_v27, 0.0 }
 0x26f   :  { %v281_v36 = vsel %vm87_vm1, %v279_v30, 0.0 }
 0x272   :  { %v250_v29 = vpop.f32.mrf.mxu0 }
 0x273   :  { %v265_v31 = vadd.f32 %v264_v28, %v250_v29 }
 0x275   :  { %v270_v33 = vsel %vm87_vm1, %v265_v31, 0.0  ;;  %v280_v34 = vmul.f32 %v265_v31, %v265_v31 }
 0x276   :  { %v271_v35 = vadd.f32 %v270_v33, %v269_v32 }
 0x277   :  { %v282_v37 = vsel %vm87_vm1, %v280_v34, 0.0 }
 0x278   :  { %v272_v38 = vrot.slane %v271_v35, 4  ;;  %v283_v39 = vadd.f32 %v282_v37, %v281_v36 }
 0x27a   :  { %v273_v40 = vadd.f32 %v272_v38, %v271_v35  ;;  %v284_v41 = vrot.slane %v283_v39, 4 }
 0x27c   :  { %v274_v43 = vrot.slane %v273_v40, 2  ;;  %v285_v44 = vadd.f32 %v284_v41, %v283_v39 }
 0x27e   :  { %v275_v45 = vadd.f32 %v274_v43, %v273_v40  ;;  %v286_v46 = vrot.slane %v285_v44, 2 }
 0x280   :  { %v276_v47 = vrot.slane %v275_v45, 1  ;;  %v287_v48 = vadd.f32 %v286_v46, %v285_v44 }
 0x282   :  { %v277_v49 = vadd.f32 %v276_v47, %v275_v45  ;;  %v288_v50 = vrot.slane %v287_v48, 1 }
 0x284   :  { %v278_v51 = vmul.f32 %v277_v49, %v1774_v42  ;;  %v289_v52 = vadd.f32 %v288_v50, %v287_v48 }
 0x286   :  { %v290_v53 = vmul.f32 %v289_v52, %v1774_v42  ;;  %v291_v54 = vmul.f32 %v278_v51, %v278_v51 }
 0x288   :  { %v292_v55 = vsub.f32 %v290_v53, %v291_v54 }
 0x28a   :  { %v293_v61 = vmax.f32 %v292_v55, 0.0 }
 0x28c   :  { %v294_v63 = vadd.f32 1e-05, %v293_v61 }
 0x28e   :  { %1584 = vrsqrt.f32 %v294_v63  ;;  %vm301_vm9 = vweird.f32 %v294_v63 }
 0x294   :  { %v1585_v0 = vpop.eup %1584 }
 0x295   :  { %v296_v1 = vmul.f32 %v1585_v0, %v294_v63  ;;  %vm302_vm8 = vweird.f32 %v1585_v0  ;;  %v639_v63 = vpack.c.bf16 %v638_v62, %v638_v62 }
 0x296   :  { %vm303_vm10 = vmor %vm301_vm9, %vm302_vm8 }
 0x297   :  { %v297_v3 = vmul.f32 %v1585_v0, %v296_v1  ;;  %v641_v1 = vsel %vm442_vm12, %v639_v63, 0 }
 0x299   :  { %v298_v4 = vmul.f32 0.5, %v297_v3 }
 0x29b   :  { %v299_v5 = vsub.f32 1.5, %v298_v4 }
 0x29d   :  { %v300_v7 = vmul.f32 %v1585_v0, %v299_v5 }
 0x29f   :  { %v304_v8 = vsel %vm303_vm10, %v1585_v0, %v300_v7  ;;  %v369_v7 = vld [vmem:[#allocation7 + $0x88] sm:$0x1] }
 0x2a0   :  { %v305_v9 = vmul.f32 %v304_v8, %v267_v6 }
 0x2a2   :  { %v306_v11 = vmul.f32 %v305_v9, %v278_v51  ;;  %v308_v12 = vperm.slane %v305_v9, 0 }
 0x2a4   :  { %v307_v13 = vsub.f32 %v268_v10, %v306_v11  ;;  %v309_v14 = vmul.f32 %v308_v12, %v263_v27  ;;  %v310_v15 = vmul.f32 %v308_v12, %v265_v31  ;;  %v370_v11 = vld [vmem:[#allocation7 + $0x89] sm:$0x1] }
 0x2a6   :  { %v311_v16 = vperm.slane %v307_v13, 0 }
 0x2a8   :  { %v313_v18 = vadd.f32 %v311_v16, %v310_v15  ;;  %v312_v19 = vadd.f32 %v311_v16, %v309_v14 }
 0x2aa   :  { %v315_v20 = vmax.f32 %v313_v18, 0.0  ;;  %v314_v21 = vmax.f32 %v312_v19, 0.0 }
 0x2ac   :  { %v316_v24 = vpack.c.bf16 %v315_v20, %v314_v21  ;;  %v697_v21 = vld [vmem:[#allocation7 + $0x110] sm:$0xff] }
 0x2ae   :  { %1529 = vmatmul.msk.bf16.vlgmr.msrb.gmra.mxu2 %vm87_vm1, %v316_v24  ;;  %1531 = vmatmul.msk.bf16.vlgmr.msra.gmra.mxu0 %vm87_vm1, %v316_v24  ;;  %v698_v24 = vld [vmem:[#allocation7 + $0x118] sm:$0xff] }
 0x32b   :  { %v364_v22 = vpop.f32.mrf.mxu0 }
 0x331   :  { %v335_v25 = vpop.f32.mrf.mxu2 }
 0x333   :  { %v366_v29 = vpop.f32.mrf.mxu0 }
 0x339   :  { %v337_v26 = vpop.f32.mrf.mxu2 }
 0x33a   :  { %v340_v17 = vpack.c.bf16 %v337_v26, %v335_v25 }
 0x33c   :  { %348 = vmatpush.bf16.msrb.mxu3 %v340_v17  ;;  %v700_v17 = vpack.c.bf16 %v698_v24, %v697_v21 }
 0x33f   :  { %1530 = vmatmul.msk.bf16.vlgmr.msrb.gmra.mxu3 %vm87_vm1, %v1756_v2 }
 0x340   :  { %473 = vmatpush.bf16.msra.mxu3 %v464_v60 }
 0x344   :  { %650 = vmatpush.bf16.msrb.mxu3 %v641_v1 }
 0x3c2   :  { %v350_v27 = vpop.f32.mrf.mxu3 }
 0x3c3   :  { %v365_v28 = vadd.f32 %v364_v22, %v350_v27  ;;  %v695_v27 = vld [vmem:[#allocation7 + $0x100] sm:$0xff] }
 0x3c5   :  { %v382_v31 = vmul.f32 %v365_v28, %v365_v28  ;;  %v372_v33 = vsel %vm371_vm11, %v365_v28, 0.0 }
 0x3c7   :  { %v384_v37 = vsel %vm371_vm11, %v382_v31, 0.0 }
 0x3ca   :  { %v352_v30 = vpop.f32.mrf.mxu3 }
 0x3cb   :  { %v367_v32 = vadd.f32 %v366_v29, %v352_v30  ;;  %v696_v29 = vld [vmem:[#allocation7 + $0x108] sm:$0xff]  ;;  %v437_v30 = vld [vmem:[#allocation7 + $0x98] sm:$0xff] }
 0x3cc   :  { %v438_v31 = vpack.c.bf16 %v437_v30, %v437_v30 }
 0x3cd   :  { %v373_v34 = vsel %vm371_vm11, %v367_v32, 0.0  ;;  %v383_v35 = vmul.f32 %v367_v32, %v367_v32 }
 0x3ce   :  { %v374_v36 = vadd.f32 %v373_v34, %v372_v33 }
 0x3cf   :  { %v385_v38 = vsel %vm371_vm11, %v383_v35, 0.0 }
 0x3d0   :  { %v375_v39 = vrot.slane %v374_v36, 4  ;;  %v386_v40 = vadd.f32 %v385_v38, %v384_v37 }
 0x3d2   :  { %v376_v41 = vadd.f32 %v375_v39, %v374_v36  ;;  %v387_v43 = vrot.slane %v386_v40, 4 }
 0x3d4   :  { %v377_v44 = vrot.slane %v376_v41, 2  ;;  %v388_v45 = vadd.f32 %v387_v43, %v386_v40 }
 0x3d6   :  { %v378_v46 = vadd.f32 %v377_v44, %v376_v41  ;;  %v389_v47 = vrot.slane %v388_v45, 2 }
 0x3d8   :  { %v379_v48 = vrot.slane %v378_v46, 1  ;;  %v390_v49 = vadd.f32 %v389_v47, %v388_v45 }
 0x3da   :  { %v380_v50 = vadd.f32 %v379_v48, %v378_v46  ;;  %v391_v51 = vrot.slane %v390_v49, 1 }
 0x3dc   :  { %v381_v52 = vmul.f32 %v380_v50, %v1774_v42  ;;  %v392_v53 = vadd.f32 %v391_v51, %v390_v49 }
 0x3de   :  { %v393_v54 = vmul.f32 %v392_v53, %v1774_v42  ;;  %v394_v55 = vmul.f32 %v381_v52, %v381_v52 }
 0x3e0   :  { %v395_v57 = vsub.f32 %v393_v54, %v394_v55 }
 0x3e2   :  { %v396_v59 = vmax.f32 %v395_v57, 0.0 }
 0x3e4   :  { %v397_v61 = vadd.f32 1e-05, %v396_v59 }
 0x3e6   :  { %1586 = vrsqrt.f32 %v397_v61  ;;  %vm404_vm14 = vweird.f32 %v397_v61 }
 0x3ec   :  { %v1587_v0 = vpop.eup %1586 }
 0x3ed   :  { %v399_v3 = vmul.f32 %v1587_v0, %v397_v61  ;;  %vm405_vm13 = vweird.f32 %v1587_v0 }
 0x3ee   :  { %vm406_vm15 = vmor %vm404_vm14, %vm405_vm13 }
 0x3ef   :  { %v400_v4 = vmul.f32 %v1587_v0, %v399_v3 }
 0x3f1   :  { %v401_v5 = vmul.f32 0.5, %v400_v4  ;;  %v533_v4 = vld [vmem:[#allocation7 + $0xb8] sm:$0xff] }
 0x3f3   :  { %v402_v6 = vsub.f32 1.5, %v401_v5  ;;  %v534_v5 = vld [vmem:[#allocation7 + $0xc0] sm:$0xff] }
 0x3f5   :  { %v403_v8 = vmul.f32 %v1587_v0, %v402_v6  ;;  %v530_v6 = vld [vmem:[#allocation7 + $0xa8] sm:$0xff] }
 0x3f7   :  { %v407_v9 = vsel %vm406_vm15, %v1587_v0, %v403_v8  ;;  %v531_v8 = vld [vmem:[#allocation7 + $0xb0] sm:$0xff] }
 0x3f8   :  { %v408_v10 = vmul.f32 %v407_v9, %v369_v7  ;;  %v535_v7 = vpack.c.bf16 %v534_v5, %v533_v4 }
 0x3fa   :  { %v409_v12 = vmul.f32 %v408_v10, %v381_v52  ;;  %v411_v13 = vperm.slane %v408_v10, 0  ;;  %v532_v10 = vpack.c.bf16 %v531_v8, %v530_v6  ;;  %546 = vmatpush.bf16.msrb.mxu0 %v535_v7 }
 0x3fc   :  { %v410_v14 = vsub.f32 %v370_v11, %v409_v12  ;;  %v412_v15 = vmul.f32 %v411_v13, %v365_v28  ;;  %v413_v16 = vmul.f32 %v411_v13, %v367_v32  ;;  %v699_v28 = vpack.c.bf16 %v696_v29, %v695_v27  ;;  %v634_v12 = vld [vmem:[#allocation7 + $0xe0] sm:$0xff]  ;;  %v635_v13 = vld [vmem:[#allocation7 + $0xe8] sm:$0xff] }
 0x3fd   :  { %v444_v32 = vsel %vm442_vm12, %v438_v31, 0  ;;  %v480_v29 = vld [vmem:[#allocation7 + $0xa0] sm:$0x1] }
 0x3fe   :  { %v414_v18 = vperm.slane %v410_v14, 0  ;;  %453 = vmatpush.bf16.msra.mxu2 %v444_v32  ;;  %v632_v14 = vld [vmem:[#allocation7 + $0xd0] sm:$0xff]  ;;  %v481_v32 = vld [vmem:[#allocation7 + $0xa1] sm:$0x1] }
 0x400   :  { %v416_v19 = vadd.f32 %v414_v18, %v413_v16  ;;  %v415_v20 = vadd.f32 %v414_v18, %v412_v15  ;;  %v637_v15 = vpack.c.bf16 %v635_v13, %v634_v12  ;;  %v633_v16 = vld [vmem:[#allocation7 + $0xd8] sm:$0xff]  ;;  %v701_v18 = vld [vmem:[#allocation7 + $0x120] sm:$0xff]  ;;  %v734_v13 = vld [vmem:[#allocation7 + $0x128] sm:$0xff] }
 0x401   :  { %v671_v12 = vld [vmem:[#allocation7 + $0xf8] sm:$0xff] }
 0x402   :  { %v418_v25 = vmax.f32 %v416_v19, 0.0  ;;  %v417_v26 = vmax.f32 %v415_v20, 0.0  ;;  %575 = vmatpush.bf16.msrb.mxu2 %v532_v10  ;;  %v702_v19 = vpack.c.bf16 %v701_v18, %v701_v18  ;;  %663 = vmatpush.bf16.msra.mxu0 %v637_v15  ;;  %v636_v20 = vpack.c.bf16 %v633_v16, %v632_v14 }
 0x403   :  { %v672_v15 = vpack.c.bf16 %v671_v12, %v671_v12  ;;  %v735_v16 = vpack.c.bf16 %v734_v13, %v734_v13 }
 0x404   :  { %v1806_v22 = vpack.c.bf16 %v418_v25, %v417_v26  ;;  %v704_v21 = vsel %vm442_vm12, %v702_v19, 0 }
 0x405   :  { %v677_v19 = vsel %vm442_vm12, %v672_v15, 0 }
 0x406   :  { %429 = vmatpush.bf16.msra.mxu1 %v1806_v22  ;;  %1534 = vmatmul.msk.bf16.vlgmr.msra.gmra.mxu3 %vm371_vm11, %v1806_v22 }
 0x407   :  { %726 = vmatpush.bf16.msra.mxu3 %v700_v17  ;;  %664 = vmatpush.bf16.msra.mxu0 %v636_v20  ;;  %v737_v20 = vsel %vm442_vm12, %v735_v16, 0 }
 0x409   :  { %1532 = vmatmul.msk.bf16.vlgmr.msra.gmra.mxu1 %vm87_vm1, %v1756_v2 }
 0x40b   :  { %727 = vmatpush.bf16.msra.mxu3 %v699_v28 }
 0x416   :  { %1538 = vmatmul.msk.bf16.vlgmr.msrb.gmra.mxu3 %vm371_vm11, %v1806_v22 }
 0x426   :  { %1542 = vmatmul.msk.bf16.vlgmr.msra.gmra.mxu3 %vm153_vm3, %v1780_v23 }
 0x486   :  { %v431_v33 = vpop.f32.mrf.mxu1 }
 0x489   :  { %v475_v36 = vpop.f32.mrf.mxu3 }
 0x48e   :  { %v433_v34 = vpop.f32.mrf.mxu1 }
 0x48f   :  { %v436_v35 = vpack.c.bf16 %v433_v34, %v431_v33 }
 0x491   :  { %1533 = vmatmul.msk.bf16.vlgmr.msra.gmra.mxu2 %vm371_vm11, %v436_v35  ;;  %v477_v39 = vpop.f32.mrf.mxu3 }
 0x492   :  { %713 = vmatpush.bf16.msra.mxu2 %v704_v21 }
 0x514   :  { %v455_v37 = vpop.f32.mrf.mxu2 }
 0x515   :  { %v1819_v38 = vadd.f32 %v475_v36, %v455_v37 }
 0x517   :  { %v492_v41 = vmul.f32 %v1819_v38, %v1819_v38  ;;  %v482_v44 = vsel %vm87_vm1, %v1819_v38, 0.0 }
 0x519   :  { %v494_v48 = vsel %vm87_vm1, %v492_v41, 0.0 }
 0x51c   :  { %v457_v40 = vpop.f32.mrf.mxu2 }
 0x51d   :  { %v1823_v43 = vadd.f32 %v477_v39, %v457_v40 }
 0x51f   :  { %v483_v45 = vsel %vm87_vm1, %v1823_v43, 0.0  ;;  %v493_v46 = vmul.f32 %v1823_v43, %v1823_v43 }
 0x520   :  { %v484_v47 = vadd.f32 %v483_v45, %v482_v44 }
 0x521   :  { %v495_v49 = vsel %vm87_vm1, %v493_v46, 0.0 }
 0x522   :  { %v485_v50 = vrot.slane %v484_v47, 4  ;;  %v496_v51 = vadd.f32 %v495_v49, %v494_v48 }
 0x524   :  { %v486_v52 = vadd.f32 %v485_v50, %v484_v47  ;;  %v497_v53 = vrot.slane %v496_v51, 4 }
 0x526   :  { %v487_v54 = vrot.slane %v486_v52, 2  ;;  %v498_v55 = vadd.f32 %v497_v53, %v496_v51 }
 0x528   :  { %v488_v56 = vadd.f32 %v487_v54, %v486_v52  ;;  %v499_v57 = vrot.slane %v498_v55, 2 }
 0x52a   :  { %v489_v58 = vrot.slane %v488_v56, 1  ;;  %v500_v59 = vadd.f32 %v499_v57, %v498_v55 }
 0x52c   :  { %v490_v60 = vadd.f32 %v489_v58, %v488_v56  ;;  %v501_v61 = vrot.slane %v500_v59, 1 }
 0x52e   :  { %v491_v62 = vmul.f32 %v490_v60, %v1774_v42  ;;  %v502_v63 = vadd.f32 %v501_v61, %v500_v59 }
 0x530   :  { %v503_v0 = vmul.f32 %v502_v63, %v1774_v42  ;;  %v504_v1 = vmul.f32 %v491_v62, %v491_v62 }
 0x532   :  { %v505_v3 = vsub.f32 %v503_v0, %v504_v1 }
 0x534   :  { %v506_v9 = vmax.f32 %v505_v3, 0.0 }
 0x536   :  { %v507_v11 = vadd.f32 1e-05, %v506_v9 }
 0x538   :  { %1588 = vrsqrt.f32 %v507_v11  ;;  %vm514_vm2 = vweird.f32 %v507_v11 }
 0x53e   :  { %v1589_v24 = vpop.eup %1588 }
 0x53f   :  { %v509_v25 = vmul.f32 %v1589_v24, %v507_v11  ;;  %vm515_vm0 = vweird.f32 %v1589_v24 }
 0x540   :  { %vm516_vm4 = vmor %vm514_vm2, %vm515_vm0 }
 0x541   :  { %v510_v26 = vmul.f32 %v1589_v24, %v509_v25 }
 0x543   :  { %v511_v17 = vmul.f32 0.5, %v510_v26 }
 0x545   :  { %v512_v27 = vsub.f32 1.5, %v511_v17 }
 0x547   :  { %v513_v28 = vmul.f32 %v1589_v24, %v512_v27 }
 0x549   :  { %v517_v30 = vsel %vm516_vm4, %v1589_v24, %v513_v28 }
 0x54a   :  { %v518_v31 = vmul.f32 %v517_v30, %v480_v29  ;;  %v582_v29 = vld [vmem:[#allocation7 + $0xc8] sm:$0x1] }
 0x54c   :  { %v519_v33 = vmul.f32 %v518_v31, %v491_v62  ;;  %v521_v34 = vperm.slane %v518_v31, 0 }
 0x54e   :  { %v520_v35 = vsub.f32 %v481_v32, %v519_v33  ;;  %v522_v36 = vmul.f32 %v521_v34, %v1819_v38  ;;  %v523_v37 = vmul.f32 %v521_v34, %v1823_v43  ;;  %v583_v32 = vld [vmem:[#allocation7 + $0xc9] sm:$0x1] }
 0x550   :  { %v524_v39 = vperm.slane %v520_v35, 0 }
 0x552   :  { %v525_v40 = vadd.f32 %v524_v39, %v522_v36  ;;  %v526_v41 = vadd.f32 %v524_v39, %v523_v37 }
 0x554   :  { %v527_v44 = vmax.f32 %v525_v40, 0.0  ;;  %v528_v45 = vmax.f32 %v526_v41, 0.0 }
 0x556   :  { %v529_v46 = vpack.c.bf16 %v528_v45, %v527_v44 }
 0x558   :  { %1535 = vmatmul.msk.bf16.vlgmr.msrb.gmra.mxu0 %vm87_vm1, %v529_v46  ;;  %1537 = vmatmul.msk.bf16.vlgmr.msrb.gmra.mxu2 %vm87_vm1, %v529_v46 }
 0x559   :  { %746 = vmatpush.bf16.msrb.mxu0 %v737_v20 }
 0x568   :  { %1539 = vmatmul.msk.bf16.vlgmr.msra.gmra.mxu0 %vm153_vm3, %v1780_v23  ;;  %1541 = vmatmul.msk.bf16.vlgmr.msra.gmra.mxu2 %vm371_vm11, %v1806_v22 }
 0x5d5   :  { %v548_v47 = vpop.f32.mrf.mxu0 }
 0x5db   :  { %v577_v43 = vpop.f32.mrf.mxu2 }
 0x5dd   :  { %v550_v38 = vpop.f32.mrf.mxu0 }
 0x5de   :  { %v553_v48 = vpack.c.bf16 %v550_v38, %v548_v47  ;;  %v652_v47 = vpop.f32.mrf.mxu3 }
 0x5e0   :  { %561 = vmatpush.bf16.msrb.mxu1 %v553_v48 }
 0x5e3   :  { %1536 = vmatmul.msk.bf16.vlgmr.msrb.gmra.mxu1 %vm87_vm1, %v1756_v2  ;;  %v579_v51 = vpop.f32.mrf.mxu2 }
 0x5e4   :  { %686 = vmatpush.bf16.msra.mxu1 %v677_v19 }
 0x5e5   :  { %v666_v38 = vpop.f32.mrf.mxu0 }
 0x5e6   :  { %v654_v48 = vpop.f32.mrf.mxu3 }
 0x660   :  { %v563_v49 = vpop.f32.mrf.mxu1 }
 0x661   :  { %v578_v50 = vadd.f32 %v577_v43, %v563_v49  ;;  %v668_v43 = vpop.f32.mrf.mxu0  ;;  %v715_v49 = vpop.f32.mrf.mxu2 }
 0x663   :  { %v594_v53 = vmul.f32 %v578_v50, %v578_v50  ;;  %v584_v55 = vsel %vm371_vm11, %v578_v50, 0.0 }
 0x665   :  { %v596_v57 = vsel %vm371_vm11, %v594_v53, 0.0 }
 0x668   :  { %v565_v52 = vpop.f32.mrf.mxu1 }
 0x669   :  { %v580_v54 = vadd.f32 %v579_v51, %v565_v52  ;;  %v729_v51 = vpop.f32.mrf.mxu3  ;;  %v717_v53 = vpop.f32.mrf.mxu2 }
 0x66b   :  { %v585_v23 = vsel %vm371_vm11, %v580_v54, 0.0  ;;  %v595_v56 = vmul.f32 %v580_v54, %v580_v54 }
 0x66c   :  { %v586_v22 = vadd.f32 %v585_v23, %v584_v55 }
 0x66d   :  { %v597_v58 = vsel %vm371_vm11, %v595_v56, 0.0 }
 0x66e   :  { %v587_v59 = vrot.slane %v586_v22, 4  ;;  %v598_v60 = vadd.f32 %v597_v58, %v596_v57 }
 0x670   :  { %v588_v61 = vadd.f32 %v587_v59, %v586_v22  ;;  %v599_v62 = vrot.slane %v598_v60, 4 }
 0x672   :  { %v589_v63 = vrot.slane %v588_v61, 2  ;;  %v600_v0 = vadd.f32 %v599_v62, %v598_v60 }
 0x674   :  { %v590_v1 = vadd.f32 %v589_v63, %v588_v61  ;;  %v601_v3 = vrot.slane %v600_v0, 2  ;;  %v667_v61 = vadd.f32 %v666_v38, %v652_v47  ;;  %v669_v63 = vadd.f32 %v668_v43, %v654_v48 }
 0x676   :  { %v591_v4 = vrot.slane %v590_v1, 1  ;;  %v602_v5 = vadd.f32 %v601_v3, %v600_v0 }
 0x678   :  { %v592_v6 = vadd.f32 %v591_v4, %v590_v1  ;;  %v603_v7 = vrot.slane %v602_v5, 1 }
 0x67a   :  { %v593_v8 = vmul.f32 %v592_v6, %v1774_v42  ;;  %v604_v9 = vadd.f32 %v603_v7, %v602_v5 }
 0x67c   :  { %v605_v10 = vmul.f32 %v604_v9, %v1774_v42  ;;  %v606_v11 = vmul.f32 %v593_v8, %v593_v8 }
 0x67e   :  { %v607_v14 = vsub.f32 %v605_v10, %v606_v11 }
 0x680   :  { %v608_v18 = vmax.f32 %v607_v14, 0.0 }
 0x682   :  { %v609_v21 = vadd.f32 1e-05, %v608_v18 }
 0x684   :  { %1590 = vrsqrt.f32 %v609_v21  ;;  %vm616_vm5 = vweird.f32 %v609_v21 }
 0x68a   :  { %v1591_v24 = vpop.eup %1590 }
 0x68b   :  { %v611_v25 = vmul.f32 %v1591_v24, %v609_v21  ;;  %vm617_vm3 = vweird.f32 %v1591_v24 }
 0x68c   :  { %vm618_vm6 = vmor %vm616_vm5, %vm617_vm3 }
 0x68d   :  { %v612_v26 = vmul.f32 %v1591_v24, %v611_v25 }
 0x68f   :  { %v613_v17 = vmul.f32 0.5, %v612_v26  ;;  %v830_v26 = vld [vmem:[#allocation7 + $0x160] sm:$0xff] }
 0x691   :  { %v614_v27 = vsub.f32 1.5, %v613_v17  ;;  %v825_v17 = vld [vmem:[#allocation7 + $0x148] sm:$0xff] }
 0x693   :  { %v615_v28 = vmul.f32 %v1591_v24, %v614_v27 }
 0x695   :  { %v619_v30 = vsel %vm618_vm6, %v1591_v24, %v615_v28  ;;  %v832_v28 = vpack.c.bf16 %v830_v26, %v830_v26 }
 0x696   :  { %v620_v31 = vmul.f32 %v619_v30, %v582_v29  ;;  %v827_v30 = vpack.c.bf16 %v825_v17, %v825_v17 }
 0x698   :  { %v621_v33 = vmul.f32 %v620_v31, %v593_v8  ;;  %v623_v34 = vperm.slane %v620_v31, 0 }
 0x69a   :  { %v622_v35 = vsub.f32 %v583_v32, %v621_v33  ;;  %v624_v36 = vmul.f32 %v623_v34, %v578_v50  ;;  %v625_v37 = vmul.f32 %v623_v34, %v580_v54  ;;  %v731_v50 = vpop.f32.mrf.mxu3  ;;  %v730_v54 = vadd.f32 %v729_v51, %v715_v49  ;;  %v772_v51 = vld [vmem:[#allocation7 + $0x130] sm:$0x1] }
 0x69b   :  { %v732_v55 = vadd.f32 %v731_v50, %v717_v53  ;;  %v837_v33 = vsel %vm442_vm12, %v832_v28, 0  ;;  %v869_v34 = vsel %vm442_vm12, %v827_v30, 0 }
 0x69c   :  { %v626_v39 = vperm.slane %v622_v35, 0  ;;  %845 = vmatpush.bf16.msrb.mxu2 %v837_v33  ;;  %877 = vmatpush.bf16.msra.mxu0 %v869_v34 }
 0x69e   :  { %v627_v40 = vadd.f32 %v626_v39, %v624_v36  ;;  %v628_v41 = vadd.f32 %v626_v39, %v625_v37  ;;  %v828_v36 = vld [vmem:[#allocation7 + $0x150] sm:$0xff]  ;;  %v829_v37 = vld [vmem:[#allocation7 + $0x158] sm:$0xff] }
 0x69f   :  { %v823_v39 = vld [vmem:[#allocation7 + $0x138] sm:$0xff] }
 0x6a0   :  { %v629_v44 = vmax.f32 %v627_v40, 0.0  ;;  %v630_v45 = vmax.f32 %v628_v41, 0.0  ;;  %v831_v40 = vpack.c.bf16 %v829_v37, %v828_v36  ;;  %v824_v41 = vld [vmem:[#allocation7 + $0x140] sm:$0xff]  ;;  %v939_v37 = vld [vmem:[#allocation7 + $0x188] sm:$0xff] }
 0x6a1   :  { %v938_v36 = vld [vmem:[#allocation7 + $0x180] sm:$0xff] }
 0x6a2   :  { %v631_v46 = vpack.c.bf16 %v630_v45, %v629_v44  ;;  %v826_v45 = vpack.c.bf16 %v824_v41, %v823_v39  ;;  %846 = vmatpush.bf16.msrb.mxu2 %v831_v40  ;;  %v935_v39 = vld [vmem:[#allocation7 + $0x170] sm:$0xff]  ;;  %v940_v40 = vpack.c.bf16 %v939_v37, %v938_v36  ;;  %v936_v41 = vld [vmem:[#allocation7 + $0x178] sm:$0xff] }
 0x6a3   :  { %v1037_v36 = vld [vmem:[#allocation7 + $0x198] sm:$0xff] }
 0x6a4   :  { %1540 = vmatmul.msk.bf16.vlgmr.msra.gmra.mxu1 %vm371_vm11, %v631_v46  ;;  %1543 = vmatmul.msk.bf16.vlgmr.msrb.gmra.mxu0 %vm371_vm11, %v631_v46 }
 0x6a5   :  { %878 = vmatpush.bf16.msra.mxu0 %v826_v45  ;;  %v937_v45 = vpack.c.bf16 %v936_v41, %v935_v39  ;;  %v1038_v39 = vpack.c.bf16 %v1037_v36, %v1037_v36 }
 0x6a7   :  { %v1080_v41 = vsel %vm442_vm12, %v1038_v39, 0 }
 0x721   :  { %v748_v52 = vpop.f32.mrf.mxu0  ;;  %v688_v58 = vpop.f32.mrf.mxu1 }
 0x722   :  { %v753_v56 = vadd.f32 %v748_v52, %v730_v54  ;;  %v693_v62 = vadd.f32 %v688_v58, %v667_v61  ;;  %v773_v54 = vld [vmem:[#allocation7 + $0x131] sm:$0x1] }
 0x729   :  { %v750_v23 = vpop.f32.mrf.mxu0  ;;  %v690_v59 = vpop.f32.mrf.mxu1 }
 0x72a   :  { %v754_v22 = vadd.f32 %v750_v23, %v732_v55  ;;  %v694_v1 = vadd.f32 %v690_v59, %v669_v63 }
 0x72c   :  { %v755_v57 = vpack.c.bf16 %v754_v22, %v753_v56 }
 0x72e   :  { %763 = vmatpush.bf16.msrb.mxu1 %v755_v57 }
 0x731   :  { %1544 = vmatmul.msk.bf16.vlgmr.msrb.gmra.mxu1 %vm87_vm1, %v1756_v2 }
 0x732   :  { %951 = vmatpush.bf16.msra.mxu1 %v940_v40 }
 0x7ae   :  { %v765_v60 = vpop.f32.mrf.mxu1 }
 0x7af   :  { %v1858_v0 = vadd.f32 %v765_v60, %v693_v62 }
 0x7b1   :  { %v785_v4 = vmul.f32 %v1858_v0, %v1858_v0  ;;  %v775_v6 = vsel %vm774_vm7, %v1858_v0, 0.0 }
 0x7b3   :  { %v787_v9 = vsel %vm774_vm7, %v785_v4, 0.0 }
 0x7b6   :  { %v767_v3 = vpop.f32.mrf.mxu1 }
 0x7b7   :  { %v771_v5 = vadd.f32 %v767_v3, %v694_v1 }
 0x7b9   :  { %v776_v2 = vsel %vm774_vm7, %v771_v5, 0.0  ;;  %v786_v7 = vmul.f32 %v771_v5, %v771_v5 }
 0x7ba   :  { %v777_v8 = vadd.f32 %v776_v2, %v775_v6  ;;  %v1878_v6 = vld [vmem:[#allocation5] sm:$0xff] }
 0x7bb   :  { %v788_v10 = vsel %vm774_vm7, %v786_v7, 0.0 }
 0x7bc   :  { %v778_v11 = vrot.slane %v777_v8, 4  ;;  %v789_v12 = vadd.f32 %v788_v10, %v787_v9 }
 0x7be   :  { %v779_v13 = vadd.f32 %v778_v11, %v777_v8  ;;  %v790_v14 = vrot.slane %v789_v12, 4 }
 0x7c0   :  { %v780_v15 = vrot.slane %v779_v13, 2  ;;  %v791_v16 = vadd.f32 %v790_v14, %v789_v12 }
 0x7c2   :  { %v781_v18 = vadd.f32 %v780_v15, %v779_v13  ;;  %v792_v19 = vrot.slane %v791_v16, 2 }
 0x7c4   :  { %v782_v20 = vrot.slane %v781_v18, 1  ;;  %v793_v21 = vadd.f32 %v792_v19, %v791_v16 }
 0x7c6   :  { %v783_v24 = vadd.f32 %v782_v20, %v781_v18  ;;  %v794_v25 = vrot.slane %v793_v21, 1 }
 0x7c8   :  { %v784_v27 = vmul.f32 %v783_v24, %v1774_v42  ;;  %v795_v29 = vadd.f32 %v794_v25, %v793_v21 }
 0x7ca   :  { %v796_v31 = vmul.f32 %v795_v29, %v1774_v42  ;;  %v797_v32 = vmul.f32 %v784_v27, %v784_v27 }
 0x7cc   :  { %v798_v35 = vsub.f32 %v796_v31, %v797_v32 }
 0x7ce   :  { %v799_v44 = vmax.f32 %v798_v35, 0.0 }
 0x7d0   :  { %v800_v46 = vadd.f32 1e-05, %v799_v44 }
 0x7d2   :  { %1592 = vrsqrt.f32 %v800_v46  ;;  %vm807_vm9 = vweird.f32 %v800_v46 }
 0x7d8   :  { %v1593_v47 = vpop.eup %1592 }
 0x7d9   :  { %v802_v38 = vmul.f32 %v1593_v47, %v800_v46  ;;  %vm808_vm8 = vweird.f32 %v1593_v47 }
 0x7da   :  { %vm809_vm10 = vmor %vm807_vm9, %vm808_vm8 }
 0x7db   :  { %v803_v48 = vmul.f32 %v1593_v47, %v802_v38 }
 0x7dd   :  { %v804_v43 = vmul.f32 0.5, %v803_v48 }
 0x7df   :  { %v805_v49 = vsub.f32 1.5, %v804_v43 }
 0x7e1   :  { %v806_v52 = vmul.f32 %v1593_v47, %v805_v49 }
 0x7e3   :  { %v810_v53 = vsel %vm809_vm10, %v1593_v47, %v806_v52 }
 0x7e4   :  { %v811_v50 = vmul.f32 %v810_v53, %v772_v51  ;;  %v885_v51 = vld [vmem:[#allocation7 + $0x168] sm:$0x1] }
 0x7e6   :  { %v812_v55 = vmul.f32 %v811_v50, %v784_v27  ;;  %v814_v23 = vperm.slane %v811_v50, 0 }
 0x7e8   :  { %v813_v56 = vsub.f32 %v773_v54, %v812_v55  ;;  %v815_v22 = vmul.f32 %v814_v23, %v1858_v0  ;;  %v816_v57 = vmul.f32 %v814_v23, %v771_v5  ;;  %v886_v54 = vld [vmem:[#allocation7 + $0x169] sm:$0x1] }
 0x7ea   :  { %v817_v58 = vperm.slane %v813_v56, 0 }
 0x7ec   :  { %v818_v59 = vadd.f32 %v817_v58, %v815_v22  ;;  %v819_v60 = vadd.f32 %v817_v58, %v816_v57 }
 0x7ee   :  { %v820_v61 = vmax.f32 %v818_v59, 0.0  ;;  %v821_v62 = vmax.f32 %v819_v60, 0.0 }
 0x7f0   :  { %v1872_v63 = vpack.c.bf16 %v821_v62, %v820_v61 }
 0x7f2   :  { %1545 = vmatmul.msk.bf16.vlgmr.msrb.gmra.mxu2 %vm774_vm7, %v1872_v63  ;;  %1547 = vmatmul.msk.bf16.vlgmr.msra.gmra.mxu0 %vm774_vm7, %v1872_v63 }
 0x86f   :  { %v880_v0 = vpop.f32.mrf.mxu0 }
 0x875   :  { %v848_v1 = vpop.f32.mrf.mxu2 }
 0x877   :  { %v882_v7 = vpop.f32.mrf.mxu0 }
 0x87d   :  { %v850_v3 = vpop.f32.mrf.mxu2 }
 0x87e   :  { %v853_v4 = vpack.c.bf16 %v850_v3, %v848_v1 }
 0x880   :  { %861 = vmatpush.bf16.msrb.mxu3 %v853_v4 }
 0x883   :  { %1546 = vmatmul.msk.bf16.vlgmr.msrb.gmra.mxu3 %vm87_vm1, %v1878_v6 }
 0x884   :  { %980 = vmatpush.bf16.msra.mxu3 %v937_v45  ;;  %v1253_v45 = vld [vmem:[#allocation7 + $0x1f0] sm:$0xff] }
 0x906   :  { %v863_v5 = vpop.f32.mrf.mxu3 }
 0x907   :  { %v881_v2 = vadd.f32 %v880_v0, %v863_v5 }
 0x909   :  { %v897_v9 = vmul.f32 %v881_v2, %v881_v2  ;;  %v887_v11 = vsel %vm87_vm1, %v881_v2, 0.0 }
 0x90b   :  { %v899_v15 = vsel %vm87_vm1, %v897_v9, 0.0 }
 0x90e   :  { %v865_v8 = vpop.f32.mrf.mxu3 }
 0x90f   :  { %v883_v10 = vadd.f32 %v882_v7, %v865_v8 }
 0x911   :  { %v888_v12 = vsel %vm87_vm1, %v883_v10, 0.0  ;;  %v898_v13 = vmul.f32 %v883_v10, %v883_v10 }
 0x912   :  { %v889_v14 = vadd.f32 %v888_v12, %v887_v11 }
 0x913   :  { %v900_v16 = vsel %vm87_vm1, %v898_v13, 0.0 }
 0x914   :  { %v890_v18 = vrot.slane %v889_v14, 4  ;;  %v901_v19 = vadd.f32 %v900_v16, %v899_v15 }
 0x916   :  { %v891_v20 = vadd.f32 %v890_v18, %v889_v14  ;;  %v902_v21 = vrot.slane %v901_v19, 4 }
 0x918   :  { %v892_v24 = vrot.slane %v891_v20, 2  ;;  %v903_v25 = vadd.f32 %v902_v21, %v901_v19 }
 0x91a   :  { %v893_v26 = vadd.f32 %v892_v24, %v891_v20  ;;  %v904_v17 = vrot.slane %v903_v25, 2 }
 0x91c   :  { %v894_v27 = vrot.slane %v893_v26, 1  ;;  %v905_v29 = vadd.f32 %v904_v17, %v903_v25 }
 0x91e   :  { %v895_v28 = vadd.f32 %v894_v27, %v893_v26  ;;  %v906_v30 = vrot.slane %v905_v29, 1 }
 0x920   :  { %v896_v31 = vmul.f32 %v895_v28, %v1774_v42  ;;  %v907_v32 = vadd.f32 %v906_v30, %v905_v29 }
 0x922   :  { %v908_v33 = vmul.f32 %v907_v32, %v1774_v42  ;;  %v909_v34 = vmul.f32 %v896_v31, %v896_v31 }
 0x924   :  { %v910_v35 = vsub.f32 %v908_v33, %v909_v34 }
 0x926   :  { %v911_v44 = vmax.f32 %v910_v35, 0.0 }
 0x928   :  { %v912_v46 = vadd.f32 1e-05, %v911_v44 }
 0x92a   :  { %1594 = vrsqrt.f32 %v912_v46  ;;  %vm919_vm14 = vweird.f32 %v912_v46 }
 0x930   :  { %v1595_v47 = vpop.eup %1594 }
 0x931   :  { %v914_v38 = vmul.f32 %v1595_v47, %v912_v46  ;;  %vm920_vm13 = vweird.f32 %v1595_v47  ;;  %v1254_v46 = vpack.c.bf16 %v1253_v45, %v1253_v45 }
 0x932   :  { %vm921_vm15 = vmor %vm919_vm14, %vm920_vm13 }
 0x933   :  { %v915_v48 = vmul.f32 %v1595_v47, %v914_v38  ;;  %v1256_v38 = vsel %vm442_vm12, %v1254_v46, 0 }
 0x935   :  { %v916_v43 = vmul.f32 0.5, %v915_v48 }
 0x937   :  { %v917_v49 = vsub.f32 1.5, %v916_v43 }
 0x939   :  { %v918_v52 = vmul.f32 %v1595_v47, %v917_v49 }
 0x93b   :  { %v922_v53 = vsel %vm921_vm15, %v1595_v47, %v918_v52  ;;  %v987_v52 = vld [vmem:[#allocation7 + $0x190] sm:$0x1] }
 0x93c   :  { %v923_v50 = vmul.f32 %v922_v53, %v885_v51 }
 0x93e   :  { %v924_v55 = vmul.f32 %v923_v50, %v896_v31  ;;  %v926_v23 = vperm.slane %v923_v50, 0 }
 0x940   :  { %v925_v56 = vsub.f32 %v886_v54, %v924_v55  ;;  %v927_v22 = vmul.f32 %v926_v23, %v881_v2  ;;  %v928_v57 = vmul.f32 %v926_v23, %v883_v10  ;;  %v988_v55 = vld [vmem:[#allocation7 + $0x191] sm:$0x1] }
 0x942   :  { %v929_v58 = vperm.slane %v925_v56, 0 }
 0x944   :  { %v930_v59 = vadd.f32 %v929_v58, %v927_v22  ;;  %v931_v60 = vadd.f32 %v929_v58, %v928_v57  ;;  %v1315_v57 = vld [vmem:[#allocation7 + $0x210] sm:$0xff] }
 0x946   :  { %v932_v61 = vmax.f32 %v930_v59, 0.0  ;;  %v933_v62 = vmax.f32 %v931_v60, 0.0 }
 0x948   :  { %v934_v1 = vpack.c.bf16 %v933_v62, %v932_v61 }
 0x94a   :  { %1548 = vmatmul.msk.bf16.vlgmr.msra.gmra.mxu1 %vm87_vm1, %v934_v1  ;;  %1550 = vmatmul.msk.bf16.vlgmr.msra.gmra.mxu3 %vm87_vm1, %v934_v1  ;;  %v1317_v1 = vpack.c.bf16 %v1315_v57, %v1315_v57  ;;  %v1249_v57 = vld [vmem:[#allocation7 + $0x1e0] sm:$0xff] }
 0x9c7   :  { %v953_v3 = vpop.f32.mrf.mxu1 }
 0x9cd   :  { %v982_v5 = vpop.f32.mrf.mxu3 }
 0x9cf   :  { %v955_v4 = vpop.f32.mrf.mxu1 }
 0x9d0   :  { %v958_v0 = vpack.c.bf16 %v955_v4, %v953_v3 }
 0x9d2   :  { %966 = vmatpush.bf16.msra.mxu2 %v958_v0 }
 0x9d5   :  { %1549 = vmatmul.msk.bf16.vlgmr.msra.gmra.mxu2 %vm87_vm1, %v1878_v6  ;;  %v984_v8 = vpop.f32.mrf.mxu3 }
 0x9d6   :  { %1089 = vmatpush.bf16.msrb.mxu2 %v1080_v41 }
 0x9da   :  { %1265 = vmatpush.bf16.msra.mxu2 %v1256_v38 }
 0xa58   :  { %v968_v2 = vpop.f32.mrf.mxu2 }
 0xa59   :  { %v983_v7 = vadd.f32 %v982_v5, %v968_v2  ;;  %v1338_v5 = vsel %vm442_vm12, %v1317_v1, 0  ;;  %v1313_v2 = vld [vmem:[#allocation7 + $0x200] sm:$0xff] }
 0xa5b   :  { %v999_v10 = vmul.f32 %v983_v7, %v983_v7  ;;  %v989_v12 = vsel %vm371_vm11, %v983_v7, 0.0 }
 0xa5d   :  { %v1001_v16 = vsel %vm371_vm11, %v999_v10, 0.0 }
 0xa60   :  { %v970_v9 = vpop.f32.mrf.mxu2 }
 0xa61   :  { %v985_v11 = vadd.f32 %v984_v8, %v970_v9  ;;  %v1314_v8 = vld [vmem:[#allocation7 + $0x208] sm:$0xff]  ;;  %v1054_v9 = vld [vmem:[#allocation7 + $0x1a0] sm:$0xff] }
 0xa62   :  { %v1055_v10 = vpack.c.bf16 %v1054_v9, %v1054_v9 }
 0xa63   :  { %v990_v13 = vsel %vm371_vm11, %v985_v11, 0.0  ;;  %v1000_v14 = vmul.f32 %v985_v11, %v985_v11 }
 0xa64   :  { %v991_v15 = vadd.f32 %v990_v13, %v989_v12 }
 0xa65   :  { %v1002_v18 = vsel %vm371_vm11, %v1000_v14, 0.0 }
 0xa66   :  { %v992_v19 = vrot.slane %v991_v15, 4  ;;  %v1003_v20 = vadd.f32 %v1002_v18, %v1001_v16 }
 0xa68   :  { %v993_v21 = vadd.f32 %v992_v19, %v991_v15  ;;  %v1004_v24 = vrot.slane %v1003_v20, 4 }
 0xa6a   :  { %v994_v25 = vrot.slane %v993_v21, 2  ;;  %v1005_v26 = vadd.f32 %v1004_v24, %v1003_v20 }
 0xa6c   :  { %v995_v17 = vadd.f32 %v994_v25, %v993_v21  ;;  %v1006_v27 = vrot.slane %v1005_v26, 2 }
 0xa6e   :  { %v996_v29 = vrot.slane %v995_v17, 1  ;;  %v1007_v28 = vadd.f32 %v1006_v27, %v1005_v26 }
 0xa70   :  { %v997_v30 = vadd.f32 %v996_v29, %v995_v17  ;;  %v1008_v31 = vrot.slane %v1007_v28, 1 }
 0xa72   :  { %v998_v32 = vmul.f32 %v997_v30, %v1774_v42  ;;  %v1009_v33 = vadd.f32 %v1008_v31, %v1007_v28 }
 0xa74   :  { %v1010_v34 = vmul.f32 %v1009_v33, %v1774_v42  ;;  %v1011_v35 = vmul.f32 %v998_v32, %v998_v32 }
 0xa76   :  { %v1012_v37 = vsub.f32 %v1010_v34, %v1011_v35 }
 0xa78   :  { %v1013_v40 = vmax.f32 %v1012_v37, 0.0 }
 0xa7a   :  { %v1014_v44 = vadd.f32 1e-05, %v1013_v40 }
 0xa7c   :  { %1596 = vrsqrt.f32 %v1014_v44  ;;  %vm1021_vm2 = vweird.f32 %v1014_v44 }
 0xa82   :  { %v1597_v47 = vpop.eup %1596 }
 0xa83   :  { %v1016_v48 = vmul.f32 %v1597_v47, %v1014_v44  ;;  %vm1022_vm0 = vweird.f32 %v1597_v47 }
 0xa84   :  { %vm1023_vm4 = vmor %vm1021_vm2, %vm1022_vm0 }
 0xa85   :  { %v1017_v43 = vmul.f32 %v1597_v47, %v1016_v48 }
 0xa87   :  { %v1018_v49 = vmul.f32 0.5, %v1017_v43  ;;  %v1149_v43 = vld [vmem:[#allocation7 + $0x1c0] sm:$0xff] }
 0xa89   :  { %v1019_v51 = vsub.f32 1.5, %v1018_v49  ;;  %v1150_v49 = vld [vmem:[#allocation7 + $0x1c8] sm:$0xff] }
 0xa8b   :  { %v1020_v53 = vmul.f32 %v1597_v47, %v1019_v51  ;;  %v1146_v51 = vld [vmem:[#allocation7 + $0x1b0] sm:$0xff] }
 0xa8d   :  { %v1024_v50 = vsel %vm1023_vm4, %v1597_v47, %v1020_v53  ;;  %v1147_v53 = vld [vmem:[#allocation7 + $0x1b8] sm:$0xff] }
 0xa8e   :  { %v1025_v54 = vmul.f32 %v1024_v50, %v987_v52  ;;  %v1151_v52 = vpack.c.bf16 %v1150_v49, %v1149_v43 }
 0xa90   :  { %v1026_v23 = vmul.f32 %v1025_v54, %v998_v32  ;;  %v1028_v56 = vperm.slane %v1025_v54, 0  ;;  %v1148_v54 = vpack.c.bf16 %v1147_v53, %v1146_v51  ;;  %1162 = vmatpush.bf16.msrb.mxu3 %v1151_v52 }
 0xa92   :  { %v1027_v22 = vsub.f32 %v988_v55, %v1026_v23  ;;  %v1029_v58 = vmul.f32 %v1028_v56, %v983_v7  ;;  %v1030_v59 = vmul.f32 %v1028_v56, %v985_v11  ;;  %v1316_v7 = vpack.c.bf16 %v1314_v8, %v1313_v2  ;;  %v1250_v23 = vld [vmem:[#allocation7 + $0x1e8] sm:$0xff] }
 0xa93   :  { %v1060_v11 = vsel %vm442_vm12, %v1055_v10, 0  ;;  %v1252_v56 = vpack.c.bf16 %v1250_v23, %v1250_v23  ;;  %v1096_v8 = vld [vmem:[#allocation7 + $0x1a8] sm:$0x1]  ;;  %v1289_v23 = vld [vmem:[#allocation7 + $0x1f8] sm:$0xff] }
 0xa94   :  { %v1031_v60 = vperm.slane %v1027_v22, 0  ;;  %1069 = vmatpush.bf16.msrb.mxu1 %v1060_v11  ;;  %v1248_v22 = vld [vmem:[#allocation7 + $0x1d8] sm:$0xff]  ;;  %v1097_v11 = vld [vmem:[#allocation7 + $0x1a9] sm:$0x1] }
 0xa96   :  { %v1033_v61 = vadd.f32 %v1031_v60, %v1030_v59  ;;  %v1032_v62 = vadd.f32 %v1031_v60, %v1029_v58  ;;  %v1318_v58 = vld [vmem:[#allocation7 + $0x218] sm:$0xff]  ;;  %v1273_v60 = vsel %vm442_vm12, %v1252_v56, 0  ;;  %v1354_v56 = vld [vmem:[#allocation7 + $0x220] sm:$0xff] }
 0xa97   :  { %v1319_v59 = vpack.c.bf16 %v1318_v58, %v1318_v58  ;;  %1281 = vmatpush.bf16.msra.mxu3 %v1273_v60  ;;  %v1355_v58 = vpack.c.bf16 %v1354_v56, %v1354_v56 }
 0xa98   :  { %v1035_v3 = vmax.f32 %v1033_v61, 0.0  ;;  %v1034_v4 = vmax.f32 %v1032_v62, 0.0  ;;  %1191 = vmatpush.bf16.msra.mxu1 %v1148_v54  ;;  %v1251_v61 = vpack.c.bf16 %v1249_v57, %v1248_v22  ;;  %v1290_v57 = vpack.c.bf16 %v1289_v23, %v1289_v23 }
 0xa99   :  { %v1321_v62 = vsel %vm442_vm12, %v1319_v59, 0 }
 0xa9a   :  { %v1900_v0 = vpack.c.bf16 %v1035_v3, %v1034_v4  ;;  %v1295_v60 = vsel %vm442_vm12, %v1290_v57, 0 }
 0xa9b   :  { %1282 = vmatpush.bf16.msra.mxu3 %v1251_v61  ;;  %v1357_v61 = vsel %vm442_vm12, %v1355_v58, 0  ;;  %vm1478_vm12 = vcmask 1041408  }
 0xa9c   :  { %1046 = vmatpush.bf16.msrb.mxu0 %v1900_v0  ;;  %1553 = vmatmul.msk.bf16.vlgmr.msrb.gmra.mxu2 %vm371_vm11, %v1900_v0 }
 0xa9d   :  { %1346 = vmatpush.bf16.msrb.mxu2 %v1338_v5 }
 0xa9f   :  { %1551 = vmatmul.msk.bf16.vlgmr.msrb.gmra.mxu0 %vm87_vm1, %v1878_v6 }
 0xaa1   :  { %1347 = vmatpush.bf16.msrb.mxu2 %v1316_v7 }
 0xaac   :  { %1557 = vmatmul.msk.bf16.vlgmr.msra.gmra.mxu2 %vm371_vm11, %v1900_v0 }
 0xabc   :  { %1561 = vmatmul.msk.bf16.vlgmr.msrb.gmra.mxu2 %vm774_vm7, %v1872_v63 }
 0xb1c   :  { %v1048_v12 = vpop.f32.mrf.mxu0 }
 0xb1f   :  { %v1091_v15 = vpop.f32.mrf.mxu2 }
 0xb24   :  { %v1050_v13 = vpop.f32.mrf.mxu0 }
 0xb25   :  { %v1053_v14 = vpack.c.bf16 %v1050_v13, %v1048_v12 }
 0xb27   :  { %1552 = vmatmul.msk.bf16.vlgmr.msrb.gmra.mxu1 %vm371_vm11, %v1053_v14  ;;  %v1093_v19 = vpop.f32.mrf.mxu2 }
 0xb28   :  { %1330 = vmatpush.bf16.msrb.mxu1 %v1321_v62 }
 0xba4   :  { %v1071_v16 = vpop.f32.mrf.mxu1 }
 0xba5   :  { %v1914_v18 = vadd.f32 %v1091_v15, %v1071_v16 }
 0xba7   :  { %v1108_v21 = vmul.f32 %v1914_v18, %v1914_v18  ;;  %v1098_v25 = vsel %vm87_vm1, %v1914_v18, 0.0 }
 0xba9   :  { %v1110_v29 = vsel %vm87_vm1, %v1108_v21, 0.0 }
 0xbac   :  { %v1073_v20 = vpop.f32.mrf.mxu1 }
 0xbad   :  { %v1918_v24 = vadd.f32 %v1093_v19, %v1073_v20 }
 0xbaf   :  { %v1099_v26 = vsel %vm87_vm1, %v1918_v24, 0.0  ;;  %v1109_v17 = vmul.f32 %v1918_v24, %v1918_v24 }
 0xbb0   :  { %v1100_v27 = vadd.f32 %v1099_v26, %v1098_v25 }
 0xbb1   :  { %v1111_v28 = vsel %vm87_vm1, %v1109_v17, 0.0 }
 0xbb2   :  { %v1101_v30 = vrot.slane %v1100_v27, 4  ;;  %v1112_v31 = vadd.f32 %v1111_v28, %v1110_v29 }
 0xbb4   :  { %v1102_v32 = vadd.f32 %v1101_v30, %v1100_v27  ;;  %v1113_v33 = vrot.slane %v1112_v31, 4 }
 0xbb6   :  { %v1103_v34 = vrot.slane %v1102_v32, 2  ;;  %v1114_v35 = vadd.f32 %v1113_v33, %v1112_v31 }
 0xbb8   :  { %v1104_v36 = vadd.f32 %v1103_v34, %v1102_v32  ;;  %v1115_v37 = vrot.slane %v1114_v35, 2 }
 0xbba   :  { %v1105_v39 = vrot.slane %v1104_v36, 1  ;;  %v1116_v40 = vadd.f32 %v1115_v37, %v1114_v35 }
 0xbbc   :  { %v1106_v41 = vadd.f32 %v1105_v39, %v1104_v36  ;;  %v1117_v44 = vrot.slane %v1116_v40, 1 }
 0xbbe   :  { %v1107_v45 = vmul.f32 %v1106_v41, %v1774_v42  ;;  %v1118_v46 = vadd.f32 %v1117_v44, %v1116_v40 }
 0xbc0   :  { %v1119_v47 = vmul.f32 %v1118_v46, %v1774_v42  ;;  %v1120_v38 = vmul.f32 %v1107_v45, %v1107_v45 }
 0xbc2   :  { %v1121_v48 = vsub.f32 %v1119_v47, %v1120_v38 }
 0xbc4   :  { %v1122_v50 = vmax.f32 %v1121_v48, 0.0 }
 0xbc6   :  { %v1123_v55 = vadd.f32 1e-05, %v1122_v50 }
 0xbc8   :  { %1598 = vrsqrt.f32 %v1123_v55  ;;  %vm1130_vm5 = vweird.f32 %v1123_v55 }
 0xbce   :  { %v1599_v1 = vpop.eup %1598 }
 0xbcf   :  { %v1125_v3 = vmul.f32 %v1599_v1, %v1123_v55  ;;  %vm1131_vm3 = vweird.f32 %v1599_v1 }
 0xbd0   :  { %vm1132_vm6 = vmor %vm1130_vm5, %vm1131_vm3 }
 0xbd1   :  { %v1126_v4 = vmul.f32 %v1599_v1, %v1125_v3 }
 0xbd3   :  { %v1127_v5 = vmul.f32 0.5, %v1126_v4 }
 0xbd5   :  { %v1128_v2 = vsub.f32 1.5, %v1127_v5 }
 0xbd7   :  { %v1129_v7 = vmul.f32 %v1599_v1, %v1128_v2 }
 0xbd9   :  { %v1133_v9 = vsel %vm1132_vm6, %v1599_v1, %v1129_v7 }
 0xbda   :  { %v1134_v10 = vmul.f32 %v1133_v9, %v1096_v8  ;;  %v1198_v8 = vld [vmem:[#allocation7 + $0x1d0] sm:$0x1] }
 0xbdc   :  { %v1135_v12 = vmul.f32 %v1134_v10, %v1107_v45  ;;  %v1137_v13 = vperm.slane %v1134_v10, 0 }
 0xbde   :  { %v1136_v14 = vsub.f32 %v1097_v11, %v1135_v12  ;;  %v1138_v15 = vmul.f32 %v1137_v13, %v1914_v18  ;;  %v1139_v16 = vmul.f32 %v1137_v13, %v1918_v24  ;;  %v1199_v11 = vld [vmem:[#allocation7 + $0x1d1] sm:$0x1] }
 0xbe0   :  { %v1140_v19 = vperm.slane %v1136_v14, 0 }
 0xbe2   :  { %v1141_v20 = vadd.f32 %v1140_v19, %v1138_v15  ;;  %v1142_v21 = vadd.f32 %v1140_v19, %v1139_v16 }
 0xbe4   :  { %v1143_v25 = vmax.f32 %v1141_v20, 0.0  ;;  %v1144_v26 = vmax.f32 %v1142_v21, 0.0 }
 0xbe6   :  { %v1145_v17 = vpack.c.bf16 %v1144_v26, %v1143_v25 }
 0xbe8   :  { %1554 = vmatmul.msk.bf16.vlgmr.msrb.gmra.mxu3 %vm87_vm1, %v1145_v17  ;;  %1556 = vmatmul.msk.bf16.vlgmr.msra.gmra.mxu1 %vm87_vm1, %v1145_v17 }
 0xbe9   :  { %1366 = vmatpush.bf16.msrb.mxu3 %v1357_v61 }
 0xbf8   :  { %1558 = vmatmul.msk.bf16.vlgmr.msra.gmra.mxu3 %vm774_vm7, %v1872_v63  ;;  %1560 = vmatmul.msk.bf16.vlgmr.msrb.gmra.mxu1 %vm371_vm11, %v1900_v0 }
 0xc65   :  { %v1193_v24 = vpop.f32.mrf.mxu1 }
 0xc6b   :  { %v1164_v27 = vpop.f32.mrf.mxu3 }
 0xc6d   :  { %v1195_v31 = vpop.f32.mrf.mxu1 }
 0xc73   :  { %v1166_v18 = vpop.f32.mrf.mxu3 }
 0xc74   :  { %v1169_v29 = vpack.c.bf16 %v1166_v18, %v1164_v27  ;;  %v1267_v27 = vpop.f32.mrf.mxu2 }
 0xc76   :  { %1177 = vmatpush.bf16.msra.mxu0 %v1169_v29 }
 0xc79   :  { %1555 = vmatmul.msk.bf16.vlgmr.msra.gmra.mxu0 %vm87_vm1, %v1878_v6 }
 0xc7a   :  { %1304 = vmatpush.bf16.msrb.mxu0 %v1295_v60 }
 0xc7b   :  { %v1284_v18 = vpop.f32.mrf.mxu3 }
 0xc7c   :  { %v1269_v29 = vpop.f32.mrf.mxu2 }
 0xcf6   :  { %v1179_v28 = vpop.f32.mrf.mxu0 }
 0xcf7   :  { %v1194_v30 = vadd.f32 %v1193_v24, %v1179_v28  ;;  %v1286_v24 = vpop.f32.mrf.mxu3  ;;  %v1332_v28 = vpop.f32.mrf.mxu1 }
 0xcf9   :  { %v1210_v33 = vmul.f32 %v1194_v30, %v1194_v30  ;;  %v1200_v35 = vsel %vm371_vm11, %v1194_v30, 0.0 }
 0xcfb   :  { %v1212_v37 = vsel %vm371_vm11, %v1210_v33, 0.0 }
 0xcfe   :  { %v1181_v32 = vpop.f32.mrf.mxu0 }
 0xcff   :  { %v1196_v34 = vadd.f32 %v1195_v31, %v1181_v32  ;;  %v1349_v31 = vpop.f32.mrf.mxu2  ;;  %v1334_v33 = vpop.f32.mrf.mxu1 }
 0xd01   :  { %v1201_v63 = vsel %vm371_vm11, %v1196_v34, 0.0  ;;  %v1211_v36 = vmul.f32 %v1196_v34, %v1196_v34 }
 0xd02   :  { %v1202_v0 = vadd.f32 %v1201_v63, %v1200_v35 }
 0xd03   :  { %v1213_v39 = vsel %vm371_vm11, %v1211_v36, 0.0 }
 0xd04   :  { %v1203_v40 = vrot.slane %v1202_v0, 4  ;;  %v1214_v41 = vadd.f32 %v1213_v39, %v1212_v37 }
 0xd06   :  { %v1204_v44 = vadd.f32 %v1203_v40, %v1202_v0  ;;  %v1215_v45 = vrot.slane %v1214_v41, 4 }
 0xd08   :  { %v1205_v46 = vrot.slane %v1204_v44, 2  ;;  %v1216_v47 = vadd.f32 %v1215_v45, %v1214_v41 }
 0xd0a   :  { %v1206_v38 = vadd.f32 %v1205_v46, %v1204_v44  ;;  %v1217_v48 = vrot.slane %v1216_v47, 2  ;;  %v1285_v44 = vadd.f32 %v1284_v18, %v1267_v27  ;;  %v1287_v46 = vadd.f32 %v1286_v24, %v1269_v29  ;;  %v1393_v18 = vld [vmem:[#allocation7 + $0x229] sm:$0x1] }
 0xd0c   :  { %v1207_v43 = vrot.slane %v1206_v38, 1  ;;  %v1218_v49 = vadd.f32 %v1217_v48, %v1216_v47 }
 0xd0e   :  { %v1208_v51 = vadd.f32 %v1207_v43, %v1206_v38  ;;  %v1219_v52 = vrot.slane %v1218_v49, 1 }
 0xd10   :  { %v1209_v53 = vmul.f32 %v1208_v51, %v1774_v42  ;;  %v1220_v50 = vadd.f32 %v1219_v52, %v1218_v49 }
 0xd12   :  { %v1221_v54 = vmul.f32 %v1220_v50, %v1774_v42  ;;  %v1222_v55 = vmul.f32 %v1209_v53, %v1209_v53 }
 0xd14   :  { %v1223_v22 = vsub.f32 %v1221_v54, %v1222_v55 }
 0xd16   :  { %v1224_v59 = vmax.f32 %v1223_v22, 0.0 }
 0xd18   :  { %v1225_v62 = vadd.f32 1e-05, %v1224_v59 }
 0xd1a   :  { %1600 = vrsqrt.f32 %v1225_v62  ;;  %vm1232_vm8 = vweird.f32 %v1225_v62 }
 0xd20   :  { %v1601_v1 = vpop.eup %1600 }
 0xd21   :  { %v1227_v3 = vmul.f32 %v1601_v1, %v1225_v62  ;;  %vm1233_vm7 = vweird.f32 %v1601_v1 }
 0xd22   :  { %vm1234_vm9 = vmor %vm1232_vm8, %vm1233_vm7 }
 0xd23   :  { %v1228_v4 = vmul.f32 %v1601_v1, %v1227_v3 }
 0xd25   :  { %v1229_v5 = vmul.f32 0.5, %v1228_v4 }
 0xd27   :  { %v1230_v2 = vsub.f32 1.5, %v1229_v5 }
 0xd29   :  { %v1231_v7 = vmul.f32 %v1601_v1, %v1230_v2 }
 0xd2b   :  { %v1235_v9 = vsel %vm1234_vm9, %v1601_v1, %v1231_v7 }
 0xd2c   :  { %v1236_v10 = vmul.f32 %v1235_v9, %v1198_v8 }
 0xd2e   :  { %v1237_v12 = vmul.f32 %v1236_v10, %v1209_v53  ;;  %v1239_v13 = vperm.slane %v1236_v10, 0 }
 0xd30   :  { %v1238_v14 = vsub.f32 %v1199_v11, %v1237_v12  ;;  %v1240_v15 = vmul.f32 %v1239_v13, %v1194_v30  ;;  %v1241_v16 = vmul.f32 %v1239_v13, %v1196_v34  ;;  %v1351_v30 = vpop.f32.mrf.mxu2  ;;  %v1350_v34 = vadd.f32 %v1349_v31, %v1332_v28  ;;  %v1466_v11 = vld [vmem:[%s1974_s3] sm:$0x3]  ;;  %v1445_v12 = vld [vmem:[#allocation7 + $0x240] sm:$0xf] }
 0xd31   :  { %v1352_v35 = vadd.f32 %v1351_v30, %v1334_v33  ;;  %v1715_v13 = vmov 0  }
 0xd32   :  { %v1242_v19 = vperm.slane %v1238_v14, 0  ;;  %1578 = vset.pattern.permute.xlu0 %v1715_v13  ;;  %v1447_v14 = vpack.c.bf16 %v1445_v12, %v1445_v12 }
 0xd33   :  { %1469 = vperm.xlu0 %1578, %v1466_v11  }
 0xd34   :  { %v1243_v20 = vadd.f32 %v1242_v19, %v1240_v15  ;;  %v1244_v21 = vadd.f32 %v1242_v19, %v1241_v16  ;;  %v1480_v16 = vsel %vm1478_vm12, %v1447_v14, 0 }
 0xd35   :  { %1488 = vmatpush.bf16.msra.mxu2 %v1480_v16 }
 0xd36   :  { %v1245_v25 = vmax.f32 %v1243_v20, 0.0  ;;  %v1246_v26 = vmax.f32 %v1244_v21, 0.0 }
 0xd38   :  { %v1247_v17 = vpack.c.bf16 %v1246_v26, %v1245_v25  ;;  %v1392_v25 = vld [vmem:[#allocation7 + $0x228] sm:$0x1] }
 0xd3a   :  { %1559 = vmatmul.msk.bf16.vlgmr.msrb.gmra.mxu0 %vm371_vm11, %v1247_v17  ;;  %1562 = vmatmul.msk.bf16.vlgmr.msrb.gmra.mxu3 %vm371_vm11, %v1247_v17  ;;  %vm1394_vm11 = vcmask 162816  }
 0xdb7   :  { %v1306_v39 = vpop.f32.mrf.mxu0 }
 0xdb8   :  { %v1311_v45 = vadd.f32 %v1306_v39, %v1285_v44  ;;  %v1444_v39 = vld [vmem:[#allocation7 + $0x238] sm:$0xff] }
 0xdbd   :  { %v1368_v32 = vpop.f32.mrf.mxu3 }
 0xdbe   :  { %v1373_v36 = vadd.f32 %v1368_v32, %v1350_v34 }
 0xdbf   :  { %v1308_v40 = vpop.f32.mrf.mxu0 }
 0xdc0   :  { %v1312_v38 = vadd.f32 %v1308_v40, %v1287_v46 }
 0xdc5   :  { %v1370_v63 = vpop.f32.mrf.mxu3 }
 0xdc6   :  { %v1374_v0 = vadd.f32 %v1370_v63, %v1352_v35 }
 0xdc8   :  { %v1375_v37 = vpack.c.bf16 %v1374_v0, %v1373_v36  ;;  %v1449_v0 = vld [vmem:[%s1973_s2] sm:$0x1]  ;;  %s1504_s2 = sshll.u32 %s1976_s5, 4  ;;  %s1505_s2 = int_to_ptr.hbm [resolvable:$true] %s1504_s2 }
 0xdca   :  { %1383 = vmatpush.bf16.msra.mxu0 %v1375_v37  ;;  %v1443_v37 = vld [vmem:[#allocation7 + $0x230] sm:$0xff] }
 0xdcb   :  { %v1446_v40 = vpack.c.bf16 %v1444_v39, %v1443_v37 }
 0xdcd   :  { %1563 = vmatmul.msk.bf16.vlgmr.msra.gmra.mxu0 %vm87_vm1, %v1878_v6  ;;  %1489 = vmatpush.bf16.msra.mxu2 %v1446_v40 }
 0xe4a   :  { %v1385_v41 = vpop.f32.mrf.mxu0 }
 0xe4b   :  { %v1390_v47 = vadd.f32 %v1385_v41, %v1311_v45  ;;  %v1470_v41 = vpop.permute.xlu0 %1469 }
 0xe4d   :  { %v1405_v43 = vmul.f32 %v1390_v47, %v1390_v47  ;;  %v1395_v51 = vsel %vm1394_vm11, %v1390_v47, 0.0 }
 0xe4f   :  { %v1407_v6 = vsel %vm1394_vm11, %v1405_v43, 0.0 }
 0xe52   :  { %v1387_v48 = vpop.f32.mrf.mxu0 }
 0xe53   :  { %v1391_v49 = vadd.f32 %v1387_v48, %v1312_v38  ;;  %v1579_v38 = vld [vmem:[#allocation7 + $0x244] ss:$0 sm:$0xff] }
 0xe55   :  { %v1396_v52 = vsel %vm1394_vm11, %v1391_v49, 0.0  ;;  %v1406_v53 = vmul.f32 %v1391_v49, %v1391_v49 }
 0xe56   :  { %v1397_v50 = vadd.f32 %v1396_v52, %v1395_v51 }
 0xe57   :  { %v1408_v54 = vsel %vm1394_vm11, %v1406_v53, 0.0 }
 0xe58   :  { %v1398_v55 = vrot.slane %v1397_v50, 4  ;;  %v1409_v23 = vadd.f32 %v1408_v54, %v1407_v6 }
 0xe5a   :  { %v1399_v56 = vadd.f32 %v1398_v55, %v1397_v50  ;;  %v1410_v22 = vrot.slane %v1409_v23, 4 }
 0xe5c   :  { %v1400_v57 = vrot.slane %v1399_v56, 2  ;;  %v1411_v58 = vadd.f32 %v1410_v22, %v1409_v23 }
 0xe5e   :  { %v1401_v59 = vadd.f32 %v1400_v57, %v1399_v56  ;;  %v1412_v60 = vrot.slane %v1411_v58, 2 }
 0xe60   :  { %v1402_v61 = vrot.slane %v1401_v59, 1  ;;  %v1413_v62 = vadd.f32 %v1412_v60, %v1411_v58 }
 0xe62   :  { %v1403_v1 = vadd.f32 %v1402_v61, %v1401_v59  ;;  %v1414_v3 = vrot.slane %v1413_v62, 1 }
 0xe64   :  { %v1404_v4 = vmul.f32 %v1403_v1, %v1774_v42  ;;  %v1415_v5 = vadd.f32 %v1414_v3, %v1413_v62 }
 0xe66   :  { %v1416_v2 = vmul.f32 %v1415_v5, %v1774_v42  ;;  %v1417_v8 = vmul.f32 %v1404_v4, %v1404_v4 }
 0xe68   :  { %v1418_v7 = vsub.f32 %v1416_v2, %v1417_v8 }
 0xe6a   :  { %v1419_v9 = vmax.f32 %v1418_v7, 0.0 }
 0xe6c   :  { %v1420_v10 = vadd.f32 1e-05, %v1419_v9 }
 0xe6e   :  { %1602 = vrsqrt.f32 %v1420_v10  ;;  %vm1427_vm13 = vweird.f32 %v1420_v10 }
 0xe74   :  { %v1603_v15 = vpop.eup %1602 }
 0xe75   :  { %v1422_v19 = vmul.f32 %v1603_v15, %v1420_v10  ;;  %vm1428_vm10 = vweird.f32 %v1603_v15 }
 0xe76   :  { %vm1429_vm14 = vmor %vm1427_vm13, %vm1428_vm10 }
 0xe77   :  { %v1423_v42 = vmul.f32 %v1603_v15, %v1422_v19 }
 0xe79   :  { %v1424_v20 = vmul.f32 0.5, %v1423_v42 }
 0xe7b   :  { %v1425_v21 = vsub.f32 1.5, %v1424_v20 }
 0xe7d   :  { %v1426_v26 = vmul.f32 %v1603_v15, %v1425_v21 }
 0xe7f   :  { %v1430_v17 = vsel %vm1429_vm14, %v1603_v15, %v1426_v26 }
 0xe80   :  { %v1431_v27 = vmul.f32 %v1430_v17, %v1392_v25 }
 0xe82   :  { %v1432_v29 = vmul.f32 %v1431_v27, %v1404_v4  ;;  %v1434_v24 = vperm.slane %v1431_v27, 0 }
 0xe84   :  { %v1433_v28 = vsub.f32 %v1393_v18, %v1432_v29  ;;  %v1435_v31 = vmul.f32 %v1434_v24, %v1390_v47  ;;  %v1436_v32 = vmul.f32 %v1434_v24, %v1391_v49 }
 0xe86   :  { %v1437_v33 = vperm.slane %v1433_v28, 0 }
 0xe88   :  { %v1439_v30 = vadd.f32 %v1437_v33, %v1436_v32  ;;  %v1438_v34 = vadd.f32 %v1437_v33, %v1435_v31 }
 0xe8a   :  { %v1441_v35 = vmax.f32 %v1439_v30, 0.0  ;;  %v1440_v63 = vmax.f32 %v1438_v34, 0.0 }
 0xe8c   :  { %v1442_v36 = vpack.c.bf16 %v1441_v35, %v1440_v63 }
 0xe8e   :  { %1460 = vmatpush.bf16.msra.mxu1 %v1442_v36 }
 0xe91   :  { %1564 = vmatmul.msk.bf16.vlgmr.msra.gmra.mxu1 %vm87_vm1, %v1449_v0  ;;  %vm1495_vm1 = vcmask 25600  }
 0xf0e   :  { %v1462_v44 = vpop.f32.mrf.mxu1 }
 0xf0f   :  { %v1472_v45 = vmul.f32 %v1470_v41, %v1462_v44 }
 0xf11   :  { %v1473_v46 = vpack.c.bf16 %v1472_v45, %v1472_v45 }
 0xf13   :  { %1565 = vmatmul.msk.bf16.vlgmr.msra.gmra.mxu2 %vm1394_vm11, %v1473_v46 }
 0xf16   :  { %v1464_v47 = vpop.f32.mrf.mxu1 }
 0xf96   :  { %v1491_v48 = vpop.f32.mrf.mxu2 }
 0xf97   :  { %v1492_v43 = vadd.f32 %v1579_v38, %v1491_v48 }
 0xf99   :  { %1496 = vst.msk [vmem:[#allocation8] sm:$0x3] %vm1495_vm1, %v1492_v43 }
 0xf9a   :  { %1507 = dma.vmem_to_hbm [thread:$0]  %s1503_s13, 32, %s1505_s2, [#allocation4]  }
 0xf9e   :  { %v1493_v49 = vpop.f32.mrf.mxu2 }
 0xf9f   :  { %1705 = dma.done.wait [#allocation4], 32  }
 0xfa0   :  { %1706 = vsyncadd [#allocation4], 4294967264 }
 0xfa1   :  { %1512 = vsyncpa [#allocation3], 1 }
 0xfa2   :  { %1513 = vsyncpa [#allocation6], 1 }
 0xfa3   :  { %1514 = vsyncpa [#allocation4], 1 }

</bundles_post_ra>
